<compile_context>
chip_gen: v6e
topology: v6e:2x2x1
jax: 0.10.0
libtpu: 0.0.40
codegen_flags: <defaults>
</compile_context>

<pallas_src>
import math
from functools import partial

import jax
import jax.numpy as jnp
from jax.experimental import pallas as pl
from jax.experimental.pallas import tpu as pltpu

LN_EPS = 1e-5


# ------------------------------- helpers ----------------------------------- #

def _layernorm(x, w, b):
    mu = jnp.mean(x, axis=-1, keepdims=True)
    var = jnp.mean((x - mu) ** 2, axis=-1, keepdims=True)
    return (x - mu) * jax.lax.rsqrt(var + LN_EPS) * w + b


def _erf_approx(z):
    # Abramowitz & Stegun 7.1.26 (|err| < 1.5e-7); only exp/abs/mul/div -> safe lowering.
    a1, a2, a3, a4, a5 = 0.254829592, -0.284496736, 1.421413741, -1.453152027, 1.061405429
    p = 0.3275911
    sgn = jnp.where(z >= 0.0, 1.0, -1.0)
    az = jnp.abs(z)
    t = 1.0 / (1.0 + p * az)
    poly = ((((a5 * t + a4) * t + a3) * t + a2) * t + a1) * t
    return sgn * (1.0 - poly * jnp.exp(-az * az))


def _gelu_exact(x):
    return 0.5 * x * (1.0 + _erf_approx(x * 0.7071067811865476))


# ------------------------------ fused kernel -------------------------------- #

def cdt_fused_kernel(emb_in_ref, temb_ref, w_emb_ref, embln_w_ref, embln_b_ref,
                     ln1w_ref, ln1b_ref, w_in_ref, b_in_ref, w_out_ref, b_out_ref,
                     ln2w_ref, ln2b_ref, w_fc1_ref, b_fc1_ref, w_fc2_ref, b_fc2_ref,
                     outln_w_ref, outln_b_ref, wh_ref, bh_ref,
                     o_ref,
                     x_ref,
                     *, num_heads, tokens_per_seq):
    layer = pl.program_id(1)
    num_layers = pl.num_programs(1)
    rows, D = x_ref.shape
    L = tokens_per_seq                      # tokens per batch element (= 2*T)
    nb = rows // L                          # batch elements in this block
    hd = D // num_heads
    scale = 1.0 / math.sqrt(hd)

    # ----- first layer step of this batch block: embeddings + emb LayerNorm -----
    @pl.when(layer == 0)
    def _embed():
        # one-hot-augmented input -> single matmul gives state/action emb + bias, already
        # interleaved in causal order (done in the wrapper, no in-kernel concat).
        x0 = (jnp.dot(emb_in_ref[...], w_emb_ref[...],
                      preferred_element_type=jnp.float32) + temb_ref[...])
        x_ref[...] = _layernorm(x0, embln_w_ref[...], embln_b_ref[...])
        # TODO(synk): embedding/attention/residual dropout are identity in eval mode; omitted.

    x = x_ref[...]                                                   # (rows, D) f32

    # causal mask over the interleaved order, rebuilt on the fly ((L,L) iota+compare --
    # cheap VPU filler, no VMEM scratch held for the kernel lifetime).
    rr = jax.lax.broadcasted_iota(jnp.int32, (L, L), 0)
    cc = jax.lax.broadcasted_iota(jnp.int32, (L, L), 1)
    neg_mask = jnp.where(cc <= rr, 0.0, -1e30)                       # (L, L) f32

    # ----- pre-norm attention (fused lane-dense QKV, batch-blocked scores) -----
    xn = _layernorm(x, ln1w_ref[0], ln1b_ref[0])
    qkv = (jnp.dot(xn.astype(jnp.bfloat16), w_in_ref[0],
                   preferred_element_type=jnp.float32) + b_in_ref[0])  # (rows, 3D) f32
    qkv = qkv.reshape(nb, L, 3 * D)                                    # batch-blocked view

    attn = jnp.zeros((rows, D), jnp.float32)
    for h in range(num_heads):          # static unroll; per-head matmuls batched over nb
        q_h = qkv[:, :, h * hd:(h + 1) * hd]                          # (nb, L, hd)
        k_h = qkv[:, :, D + h * hd:D + (h + 1) * hd]
        v_h = qkv[:, :, 2 * D + h * hd:2 * D + (h + 1) * hd]
        s = jnp.einsum('bld,bmd->blm', q_h, k_h,
                       preferred_element_type=jnp.float32) * scale + neg_mask
        s = s - jnp.max(s, axis=-1, keepdims=True)
        p = jnp.exp(s)
        p = p * pl.reciprocal(jnp.sum(p, axis=-1, keepdims=True), approx=True)
        ctx_h = jnp.einsum('blm,bmd->bld', p, v_h,
                           preferred_element_type=jnp.float32)        # (nb, L, hd)
        # output projection: lane-dense (hd, D) weight slab per head, accumulated -> no
        # (H, rows, D) intermediate, no cross-head reduce, no minor-dim concat.
        attn = attn + jnp.dot(ctx_h.reshape(rows, hd).astype(jnp.bfloat16),
                              w_out_ref[0, h], preferred_element_type=jnp.float32)
    x = x + attn + b_out_ref[0]

    # ----- pre-norm MLP (exact-erf GELU) -----
    xn2 = _layernorm(x, ln2w_ref[0], ln2b_ref[0])
    h1 = (jnp.dot(xn2.astype(jnp.bfloat16), w_fc1_ref[0],
                  preferred_element_type=jnp.float32) + b_fc1_ref[0])
    h1 = _gelu_exact(h1)
    x = x + (jnp.dot(h1.astype(jnp.bfloat16), w_fc2_ref[0],
                     preferred_element_type=jnp.float32) + b_fc2_ref[0])
    x_ref[...] = x

    # ----- last layer: out LayerNorm + merged (action | cost | state) head projection -----
    @pl.when(layer == num_layers - 1)
    def _heads():
        out = _layernorm(x, outln_w_ref[...], outln_b_ref[...])
        o_ref[...] = (jnp.dot(out, wh_ref[...],
                              preferred_element_type=jnp.float32) + bh_ref[...])


# ------------------------------ parameters --------------------------------- #

def init_cdt_params(key, cfg):
    D = cfg["embedding_dim"]
    S, A = cfg["state_dim"], cfg["action_dim"]
    std = 0.02

    def nrm(k, shape):
        return jax.random.normal(k, shape, jnp.float32) * std

    keys = iter(jax.random.split(key, 64))
    params = {
        "timestep_emb": nrm(next(keys), (cfg["episode_len"] + cfg["seq_len"], D)),
        "state_emb_w": nrm(next(keys), (S, D)), "state_emb_b": jnp.zeros((1, D)),
        "action_emb_w": nrm(next(keys), (A, D)), "action_emb_b": jnp.zeros((1, D)),
        "emb_norm_w": jnp.ones((1, D)), "emb_norm_b": jnp.zeros((1, D)),
        "out_norm_w": jnp.ones((1, D)), "out_norm_b": jnp.zeros((1, D)),
        # action_head_layers=1, deterministic => single Linear(D, A)
        "action_head_w": nrm(next(keys), (D, A)), "action_head_b": jnp.zeros((1, A)),
        "state_head_w": nrm(next(keys), (D, S)), "state_head_b": jnp.zeros((1, S)),
        "cost_head_w": nrm(next(keys), (D, 2)), "cost_head_b": jnp.zeros((1, 2)),
        "blocks": [],
    }
    for _ in range(cfg["num_layers"]):
        params["blocks"].append({
            "ln1_w": jnp.ones((1, D)), "ln1_b": jnp.zeros((1, D)),
            "w_in": nrm(next(keys), (D, 3 * D)), "b_in": jnp.zeros((1, 3 * D)),
            "w_out": nrm(next(keys), (D, D)), "b_out": jnp.zeros((1, D)),
            "ln2_w": jnp.ones((1, D)), "ln2_b": jnp.zeros((1, D)),
            "w_fc1": nrm(next(keys), (D, 4 * D)), "b_fc1": jnp.zeros((1, 4 * D)),
            "w_fc2": nrm(next(keys), (4 * D, D)), "b_fc2": jnp.zeros((1, D)),
        })
    return params


# ------------------------------- forward ------------------------------------ #

def cdt_forward(params, states, actions, returns_to_go, costs_to_go, time_steps, cfg,
                batch_block=1):
    # returns_to_go / costs_to_go unused under default config (use_rew/use_cost False).
    del returns_to_go, costs_to_go
    B, T, S = states.shape
    A = actions.shape[-1]
    D = cfg["embedding_dim"]
    H = cfg["num_heads"]
    NL = cfg["num_layers"]
    hd = D // H
    L = 2 * T
    R = B * L
    HOUT = A + 2 + S                               # merged head output width
    K_EMB = S + A + 2                              # [state | action | state-bias | action-bias]

    assert B % batch_block == 0
    num_bb = B // batch_block
    rows_blk = batch_block * L
    assert rows_blk % 8 == 0 or num_bb == 1

    # ---- wrapper-side layout plumbing (XLA): interleaved tokens + one-hot bias cols ----
    emb_in = jnp.zeros((B, T, 2, K_EMB), jnp.float32)
    emb_in = emb_in.at[:, :, 0, :S].set(states)
    emb_in = emb_in.at[:, :, 0, S + A].set(1.0)
    emb_in = emb_in.at[:, :, 1, S:S + A].set(actions)
    emb_in = emb_in.at[:, :, 1, S + A + 1].set(1.0)
    emb_in = emb_in.reshape(R, K_EMB)              # rows: (b, t, s/a) interleaved

    w_emb = jnp.concatenate([params["state_emb_w"], params["action_emb_w"],
                             params["state_emb_b"], params["action_emb_b"]],
                            axis=0)                # (K_EMB, D)

    t_emb = jnp.take(params["timestep_emb"], time_steps, axis=0)      # (B, T, D)
    t_emb_tok = jnp.repeat(t_emb, 2, axis=1).reshape(R, D)            # per-token time emb

    blocks = params["blocks"]

    def stack(name):
        return jnp.stack([blk[name] for blk in blocks], axis=0)

    bf16 = jnp.bfloat16
    ln1_w, ln1_b = stack("ln1_w"), stack("ln1_b")                     # (NL, 1, D) f32
    ln2_w, ln2_b = stack("ln2_w"), stack("ln2_b")
    w_in = stack("w_in").astype(bf16)                                 # (NL, D, 3D)
    b_in = stack("b_in")                                              # (NL, 1, 3D) f32
    w_out_h = stack("w_out").reshape(NL, H, hd, D).astype(bf16)       # lane-dense per head
    b_out = stack("b_out")
    w_fc1, b_fc1 = stack("w_fc1").astype(bf16), stack("b_fc1")
    w_fc2, b_fc2 = stack("w_fc2").astype(bf16), stack("b_fc2")

    # merged output heads: [action (A) | cost (2) | state (S)]  (f32, tiny)
    w_heads = jnp.concatenate([params["action_head_w"], params["cost_head_w"],
                               params["state_head_w"]], axis=1)       # (D, HOUT)
    b_heads = jnp.concatenate([params["action_head_b"], params["cost_head_b"],
                               params["state_head_b"]], axis=1)       # (1, HOUT)

    # TODO(synk): at larger model sizes the embed-only / tail-only operands should be
    # moved to memory_space=pl.ANY + manual DMA inside the layer==0 / last-layer blocks.
    def const_spec(arr):
        nd = arr.ndim
        return pl.BlockSpec(arr.shape, lambda bb, l, _nd=nd: (0,) * _nd)

    def token_spec(arr):
        return pl.BlockSpec((rows_blk, arr.shape[1]), lambda bb, l: (bb, 0))

    def layer_spec(arr):
        nd = arr.ndim
        return pl.BlockSpec((1,) + arr.shape[1:],
                            lambda bb, l, _nd=nd: (l,) + (0,) * (_nd - 1))

    operands = [
        emb_in, t_emb_tok, w_emb,
        params["emb_norm_w"], params["emb_norm_b"],
        ln1_w, ln1_b, w_in, b_in, w_out_h, b_out,
        ln2_w, ln2_b, w_fc1, b_fc1, w_fc2, b_fc2,
        params["out_norm_w"], params["out_norm_b"], w_heads, b_heads,
    ]
    in_specs = [
        token_spec(emb_in), token_spec(t_emb_tok), const_spec(w_emb),
        const_spec(params["emb_norm_w"]), const_spec(params["emb_norm_b"]),
        layer_spec(ln1_w), layer_spec(ln1_b), layer_spec(w_in), layer_spec(b_in),
        layer_spec(w_out_h), layer_spec(b_out),
        layer_spec(ln2_w), layer_spec(ln2_b), layer_spec(w_fc1), layer_spec(b_fc1),
        layer_spec(w_fc2), layer_spec(b_fc2),
        const_spec(params["out_norm_w"]), const_spec(params["out_norm_b"]),
        const_spec(w_heads), const_spec(b_heads),
    ]

    out_slab = pl.pallas_call(
        partial(cdt_fused_kernel, num_heads=H, tokens_per_seq=L),
        out_shape=jax.ShapeDtypeStruct((R, HOUT), jnp.float32),
        grid=(num_bb, NL),
        in_specs=in_specs,
        out_specs=pl.BlockSpec((rows_blk, HOUT), lambda bb, l: (bb, 0)),
        scratch_shapes=[pltpu.VMEM((rows_blk, D), jnp.float32)],      # residual stream
        compiler_params=pltpu.CompilerParams(
            dimension_semantics=("parallel", "arbitrary"),            # batch || , layers seq
            vmem_limit_bytes=32 * 1024 * 1024),
    )(*operands)

    # split the merged head output outside the kernel (tiny arrays).
    out_r = out_slab.reshape(B, T, 2, HOUT)
    state_tok = out_r[:, :, 0]                  # features of state tokens
    action_tok = out_r[:, :, 1]                 # features of action tokens
    action_preds = state_tok[..., :A]
    cost_preds = jax.nn.log_softmax(action_tok[..., A:A + 2], axis=-1)
    state_preds = action_tok[..., A + 2:]
    return action_preds, cost_preds, state_preds


# ------------------------- pure-JAX reference (validation) ------------------- #

def cdt_forward_ref(params, states, actions, time_steps, cfg):
    """Mirrors the PyTorch CDT forward (default flags). Matmul inputs are rounded to bf16
    exactly as in the kernel so the comparison isolates kernel bugs, not dtype rounding."""
    B, T, S = states.shape
    A = actions.shape[-1]
    D, H = cfg["embedding_dim"], cfg["num_heads"]
    hd = D // H
    L = 2 * T

    def ln(x, w, b):
        mu = jnp.mean(x, axis=-1, keepdims=True)
        var = jnp.mean((x - mu) ** 2, axis=-1, keepdims=True)
        return (x - mu) * jax.lax.rsqrt(var + LN_EPS) * w + b

    def bmm(a, w):  # bf16-input matmul with f32 accumulation (mirrors the kernel)
        return jnp.dot(a.astype(jnp.bfloat16).astype(jnp.float32),
                       w.astype(jnp.bfloat16).astype(jnp.float32))

    t_emb = jnp.take(params["timestep_emb"], time_steps, axis=0)
    s_emb = states @ params["state_emb_w"] + params["state_emb_b"] + t_emb
    a_emb = actions @ params["action_emb_w"] + params["action_emb_b"] + t_emb
    x = jnp.stack([s_emb, a_emb], axis=2).reshape(B, L, D)            # interleaved
    x = ln(x, params["emb_norm_w"], params["emb_norm_b"])
    causal = jnp.tril(jnp.ones((L, L), bool))
    for blk in params["blocks"]:
        xn = ln(x, blk["ln1_w"], blk["ln1_b"])
        qkv = bmm(xn, blk["w_in"]) + blk["b_in"]
        q, k, v = jnp.split(qkv, 3, axis=-1)
        q = q.reshape(B, L, H, hd).transpose(0, 2, 1, 3)
        k = k.reshape(B, L, H, hd).transpose(0, 2, 1, 3)
        v = v.reshape(B, L, H, hd).transpose(0, 2, 1, 3)
        s = jnp.einsum('bhld,bhmd->bhlm', q, k) / math.sqrt(hd)
        s = jnp.where(causal, s, -jnp.inf)
        p = jax.nn.softmax(s, axis=-1)
        ctx = jnp.einsum('bhlm,bhmd->bhld', p, v).transpose(0, 2, 1, 3).reshape(B, L, D)
        x = x + bmm(ctx, blk["w_out"]) + blk["b_out"]
        xn2 = ln(x, blk["ln2_w"], blk["ln2_b"])
        h1 = jax.nn.gelu(bmm(xn2, blk["w_fc1"]) + blk["b_fc1"], approximate=False)
        x = x + bmm(h1, blk["w_fc2"]) + blk["b_fc2"]
    x = ln(x, params["out_norm_w"], params["out_norm_b"])
    x = x.reshape(B, T, 2, D)
    state_feat, action_feat = x[:, :, 0], x[:, :, 1]
    action_preds = state_feat @ params["action_head_w"] + params["action_head_b"]
    cost_logits = action_feat @ params["cost_head_w"] + params["cost_head_b"]
    cost_preds = jax.nn.log_softmax(cost_logits, axis=-1)
    state_preds = action_feat @ params["state_head_w"] + params["state_head_b"]
    return action_preds, cost_preds, state_preds


# --------------------------------- main -------------------------------------- #

if __name__ == "__main__":
    cfg = dict(state_dim=4, action_dim=3, seq_len=8, episode_len=100,
               embedding_dim=32, num_layers=2, num_heads=4)
    B, T = 2, cfg["seq_len"]

    key = jax.random.PRNGKey(0)
    kp, ks, ka, kr, kc, kt = jax.random.split(key, 6)

    params = init_cdt_params(kp, cfg)
    states = jax.random.normal(ks, (B, T, cfg["state_dim"]), jnp.float32)
    actions = jax.random.normal(ka, (B, T, cfg["action_dim"]), jnp.float32)
    returns_to_go = jax.random.normal(kr, (B, T), jnp.float32)
    costs_to_go = jax.random.normal(kc, (B, T), jnp.float32)
    time_steps = jax.random.randint(kt, (B, T), 0, cfg["episode_len"])

    fwd = jax.jit(partial(cdt_forward, cfg=cfg))
    action_preds, cost_preds, state_preds = fwd(
        params, states, actions, returns_to_go, costs_to_go, time_steps)
    jax.block_until_ready((action_preds, cost_preds, state_preds))

    assert action_preds.shape == (B, T, cfg["action_dim"])
    assert cost_preds.shape == (B, T, 2)
    assert state_preds.shape == (B, T, cfg["state_dim"])
    assert bool(jnp.all(jnp.isfinite(action_preds)))
    assert bool(jnp.all(jnp.isfinite(cost_preds)))
    assert bool(jnp.all(jnp.isfinite(state_preds)))
    # log_softmax rows must sum to 1 in prob space
    assert bool(jnp.allclose(jnp.sum(jnp.exp(cost_preds), axis=-1), 1.0, atol=1e-5))

    # numerical check against a plain-JAX reference of the PyTorch forward
    ref_a, ref_c, ref_s = cdt_forward_ref(params, states, actions, time_steps, cfg)
    for got, ref in ((action_preds, ref_a), (cost_preds, ref_c), (state_preds, ref_s)):
        assert float(jnp.max(jnp.abs(got - ref))) < 5e-3

    print("KERNEL_OK")
</pallas_src>

<mosaic_0001>
module attributes {stable_mosaic.version = 11 : i64} {
  func.func @cdt_fused_kernel(%arg0: i32, %arg1: i32, %arg2: memref<16x9xf32, #tpu.memory_space<vmem>>, %arg3: memref<16x32xf32, #tpu.memory_space<vmem>>, %arg4: memref<9x32xf32, #tpu.memory_space<vmem>>, %arg5: memref<1x32xf32, #tpu.memory_space<vmem>>, %arg6: memref<1x32xf32, #tpu.memory_space<vmem>>, %arg7: memref<1x1x32xf32, #tpu.memory_space<vmem>>, %arg8: memref<1x1x32xf32, #tpu.memory_space<vmem>>, %arg9: memref<1x32x96xbf16, #tpu.memory_space<vmem>>, %arg10: memref<1x1x96xf32, #tpu.memory_space<vmem>>, %arg11: memref<1x4x8x32xbf16, #tpu.memory_space<vmem>>, %arg12: memref<1x1x32xf32, #tpu.memory_space<vmem>>, %arg13: memref<1x1x32xf32, #tpu.memory_space<vmem>>, %arg14: memref<1x1x32xf32, #tpu.memory_space<vmem>>, %arg15: memref<1x32x128xbf16, #tpu.memory_space<vmem>>, %arg16: memref<1x1x128xf32, #tpu.memory_space<vmem>>, %arg17: memref<1x128x32xbf16, #tpu.memory_space<vmem>>, %arg18: memref<1x1x32xf32, #tpu.memory_space<vmem>>, %arg19: memref<1x32xf32, #tpu.memory_space<vmem>>, %arg20: memref<1x32xf32, #tpu.memory_space<vmem>>, %arg21: memref<32x9xf32, #tpu.memory_space<vmem>>, %arg22: memref<1x9xf32, #tpu.memory_space<vmem>>, %arg23: memref<16x9xf32, #tpu.memory_space<vmem>>, %arg24: memref<16x32xf32, #tpu.memory_space<vmem>>) attributes {dimension_semantics = [#tpu.dimension_semantics<parallel>, #tpu.dimension_semantics<arbitrary>], iteration_bounds = array<i64: 2, 2>, scalar_prefetch = 0 : i64, scratch_operands = 1 : i64, tpu.core_type = #tpu.core_type<tc>, window_params = [{transform_indices = @transform_0, window_bounds = array<i64: 16, 9>}, {transform_indices = @transform_1, window_bounds = array<i64: 16, 32>}, {pipeline_mode = #tpu.pipeline_mode<synchronous>, transform_indices = @transform_2, window_bounds = array<i64: 9, 32>}, {pipeline_mode = #tpu.pipeline_mode<synchronous>, transform_indices = @transform_3, window_bounds = array<i64: 1, 32>}, {pipeline_mode = #tpu.pipeline_mode<synchronous>, transform_indices = @transform_4, window_bounds = array<i64: 1, 32>}, {transform_indices = @transform_5, window_bounds = array<i64: 1, 1, 32>}, {transform_indices = @transform_6, window_bounds = array<i64: 1, 1, 32>}, {transform_indices = @transform_7, window_bounds = array<i64: 1, 32, 96>}, {transform_indices = @transform_8, window_bounds = array<i64: 1, 1, 96>}, {transform_indices = @transform_9, window_bounds = array<i64: 1, 4, 8, 32>}, {transform_indices = @transform_10, window_bounds = array<i64: 1, 1, 32>}, {transform_indices = @transform_11, window_bounds = array<i64: 1, 1, 32>}, {transform_indices = @transform_12, window_bounds = array<i64: 1, 1, 32>}, {transform_indices = @transform_13, window_bounds = array<i64: 1, 32, 128>}, {transform_indices = @transform_14, window_bounds = array<i64: 1, 1, 128>}, {transform_indices = @transform_15, window_bounds = array<i64: 1, 128, 32>}, {transform_indices = @transform_16, window_bounds = array<i64: 1, 1, 32>}, {pipeline_mode = #tpu.pipeline_mode<synchronous>, transform_indices = @transform_17, window_bounds = array<i64: 1, 32>}, {pipeline_mode = #tpu.pipeline_mode<synchronous>, transform_indices = @transform_18, window_bounds = array<i64: 1, 32>}, {pipeline_mode = #tpu.pipeline_mode<synchronous>, transform_indices = @transform_19, window_bounds = array<i64: 32, 9>}, {pipeline_mode = #tpu.pipeline_mode<synchronous>, transform_indices = @transform_20, window_bounds = array<i64: 1, 9>}, {transform_indices = @transform_21, window_bounds = array<i64: 16, 9>}]} {
    %c0_i32 = arith.constant 0 : i32
    %0 = arith.cmpi eq, %arg1, %c0_i32 : i32
    %1 = arith.extui %0 : i1 to i32
    %c0_i32_0 = arith.constant 0 : i32
    %2 = arith.cmpi ne, %1, %c0_i32_0 : i32
    scf.if %2 {
      %c0_106 = arith.constant 0 : index
      %c0_107 = arith.constant 0 : index
      %239 = vector.load %arg2[%c0_106, %c0_107] : memref<16x9xf32, #tpu.memory_space<vmem>>, vector<16x9xf32>
      %c0_108 = arith.constant 0 : index
      %c0_109 = arith.constant 0 : index
      %240 = vector.load %arg4[%c0_108, %c0_109] : memref<9x32xf32, #tpu.memory_space<vmem>>, vector<9x32xf32>
      %cst_110 = arith.constant dense<0.000000e+00> : vector<16x32xf32>
      %241 = tpu.matmul %239, %240, %cst_110 {dimension_numbers = #tpu.dot_dimension_numbers<[1], [0], [0], [1], [0, 0, 1, 1], [], []>} : vector<16x9xf32>, vector<9x32xf32>, vector<16x32xf32> -> vector<16x32xf32>
      %c0_111 = arith.constant 0 : index
      %c0_112 = arith.constant 0 : index
      %242 = vector.load %arg3[%c0_111, %c0_112] : memref<16x32xf32, #tpu.memory_space<vmem>>, vector<16x32xf32>
      %243 = arith.addf %241, %242 : vector<16x32xf32>
      %c0_113 = arith.constant 0 : index
      %c0_114 = arith.constant 0 : index
      %244 = vector.load %arg5[%c0_113, %c0_114] : memref<1x32xf32, #tpu.memory_space<vmem>>, vector<1x32xf32>
      %c0_115 = arith.constant 0 : index
      %c0_116 = arith.constant 0 : index
      %245 = vector.load %arg6[%c0_115, %c0_116] : memref<1x32xf32, #tpu.memory_space<vmem>>, vector<1x32xf32>
      %cst_117 = arith.constant dense<0.000000e+00> : vector<16xf32>
      %246 = vector.multi_reduction <add>, %243, %cst_117 [1] : vector<16x32xf32> to vector<16xf32>
      %247 = vector.shape_cast %246 : vector<16xf32> to vector<16x1xf32>
      %cst_118 = arith.constant 3.200000e+01 : f32
      %248 = vector.broadcast %cst_118 : f32 to vector<16x1xf32>
      %249 = arith.divf %247, %248 : vector<16x1xf32>
      %250 = vector.broadcast %249 : vector<16x1xf32> to vector<16x32xf32>
      %251 = arith.subf %243, %250 : vector<16x32xf32>
      %252 = arith.mulf %251, %251 : vector<16x32xf32>
      %cst_119 = arith.constant dense<0.000000e+00> : vector<16xf32>
      %253 = vector.multi_reduction <add>, %252, %cst_119 [1] : vector<16x32xf32> to vector<16xf32>
      %254 = vector.shape_cast %253 : vector<16xf32> to vector<16x1xf32>
      %cst_120 = arith.constant 3.200000e+01 : f32
      %255 = vector.broadcast %cst_120 : f32 to vector<16x1xf32>
      %256 = arith.divf %254, %255 : vector<16x1xf32>
      %257 = vector.broadcast %249 : vector<16x1xf32> to vector<16x32xf32>
      %258 = arith.subf %243, %257 : vector<16x32xf32>
      %cst_121 = arith.constant 9.99999974E-6 : f32
      %259 = vector.broadcast %cst_121 : f32 to vector<16x1xf32>
      %260 = arith.addf %256, %259 : vector<16x1xf32>
      %261 = math.rsqrt %260 : vector<16x1xf32>
      %262 = vector.broadcast %261 : vector<16x1xf32> to vector<16x32xf32>
      %263 = arith.mulf %258, %262 : vector<16x32xf32>
      %264 = vector.broadcast %244 : vector<1x32xf32> to vector<16x32xf32>
      %265 = arith.mulf %263, %264 : vector<16x32xf32>
      %266 = vector.broadcast %245 : vector<1x32xf32> to vector<16x32xf32>
      %267 = arith.addf %265, %266 : vector<16x32xf32>
      %c0_122 = arith.constant 0 : index
      %c0_123 = arith.constant 0 : index
      %268 = vector.load %arg24[%c0_122, %c0_123] : memref<16x32xf32, #tpu.memory_space<vmem>>, vector<16x32xf32>
      tpu.vector_store %arg24[%c0_122, %c0_123], %267 {strides = array<i32>} : memref<16x32xf32, #tpu.memory_space<vmem>>, vector<16x32xf32>,
    } else {
    }
    %c0 = arith.constant 0 : index
    %c0_1 = arith.constant 0 : index
    %3 = vector.load %arg24[%c0, %c0_1] : memref<16x32xf32, #tpu.memory_space<vmem>>, vector<16x32xf32>
    %4 = tpu.iota {dimensions = array<i32: 0>} : vector<16x16xi32>
    %5 = tpu.iota {dimensions = array<i32: 1>} : vector<16x16xi32>
    %6 = arith.cmpi sle, %5, %4 : vector<16x16xi32>
    %cst = arith.constant 0.000000e+00 : f32
    %cst_2 = arith.constant -1.000000e+30 : f32
    %7 = vector.broadcast %cst : f32 to vector<16x16xf32>
    %8 = vector.broadcast %cst_2 : f32 to vector<16x16xf32>
    %9 = arith.select %6, %7, %8 : vector<16x16xi1>, vector<16x16xf32>
    %c0_3 = arith.constant 0 : index
    %c0_4 = arith.constant 0 : index
    %c0_5 = arith.constant 0 : index
    %10 = vector.load %arg7[%c0_3, %c0_4, %c0_5] : memref<1x1x32xf32, #tpu.memory_space<vmem>>, vector<1x1x32xf32>
    %11 = vector.shape_cast %10 : vector<1x1x32xf32> to vector<1x32xf32>
    %c0_6 = arith.constant 0 : index
    %c0_7 = arith.constant 0 : index
    %c0_8 = arith.constant 0 : index
    %12 = vector.load %arg8[%c0_6, %c0_7, %c0_8] : memref<1x1x32xf32, #tpu.memory_space<vmem>>, vector<1x1x32xf32>
    %13 = vector.shape_cast %12 : vector<1x1x32xf32> to vector<1x32xf32>
    %cst_9 = arith.constant dense<0.000000e+00> : vector<16xf32>
    %14 = vector.multi_reduction <add>, %3, %cst_9 [1] : vector<16x32xf32> to vector<16xf32>
    %15 = vector.shape_cast %14 : vector<16xf32> to vector<16x1xf32>
    %cst_10 = arith.constant 3.200000e+01 : f32
    %16 = vector.broadcast %cst_10 : f32 to vector<16x1xf32>
    %17 = arith.divf %15, %16 : vector<16x1xf32>
    %18 = vector.broadcast %17 : vector<16x1xf32> to vector<16x32xf32>
    %19 = arith.subf %3, %18 : vector<16x32xf32>
    %20 = arith.mulf %19, %19 : vector<16x32xf32>
    %cst_11 = arith.constant dense<0.000000e+00> : vector<16xf32>
    %21 = vector.multi_reduction <add>, %20, %cst_11 [1] : vector<16x32xf32> to vector<16xf32>
    %22 = vector.shape_cast %21 : vector<16xf32> to vector<16x1xf32>
    %cst_12 = arith.constant 3.200000e+01 : f32
    %23 = vector.broadcast %cst_12 : f32 to vector<16x1xf32>
    %24 = arith.divf %22, %23 : vector<16x1xf32>
    %25 = vector.broadcast %17 : vector<16x1xf32> to vector<16x32xf32>
    %26 = arith.subf %3, %25 : vector<16x32xf32>
    %cst_13 = arith.constant 9.99999974E-6 : f32
    %27 = vector.broadcast %cst_13 : f32 to vector<16x1xf32>
    %28 = arith.addf %24, %27 : vector<16x1xf32>
    %29 = math.rsqrt %28 : vector<16x1xf32>
    %30 = vector.broadcast %29 : vector<16x1xf32> to vector<16x32xf32>
    %31 = arith.mulf %26, %30 : vector<16x32xf32>
    %32 = vector.broadcast %11 : vector<1x32xf32> to vector<16x32xf32>
    %33 = arith.mulf %31, %32 : vector<16x32xf32>
    %34 = vector.broadcast %13 : vector<1x32xf32> to vector<16x32xf32>
    %35 = arith.addf %33, %34 : vector<16x32xf32>
    %36 = arith.truncf %35 : vector<16x32xf32> to vector<16x32xbf16>
    %c0_14 = arith.constant 0 : index
    %c0_15 = arith.constant 0 : index
    %c0_16 = arith.constant 0 : index
    %37 = vector.load %arg9[%c0_14, %c0_15, %c0_16] : memref<1x32x96xbf16, #tpu.memory_space<vmem>>, vector<1x32x96xbf16>
    %38 = vector.shape_cast %37 : vector<1x32x96xbf16> to vector<32x96xbf16>
    %cst_17 = arith.constant dense<0.000000e+00> : vector<16x96xf32>
    %39 = tpu.matmul %36, %38, %cst_17 {dimension_numbers = #tpu.dot_dimension_numbers<[1], [0], [0], [1], [0, 0, 1, 1], [], []>} : vector<16x32xbf16>, vector<32x96xbf16>, vector<16x96xf32> -> vector<16x96xf32>
    %c0_18 = arith.constant 0 : index
    %c0_19 = arith.constant 0 : index
    %c0_20 = arith.constant 0 : index
    %40 = vector.load %arg10[%c0_18, %c0_19, %c0_20] : memref<1x1x96xf32, #tpu.memory_space<vmem>>, vector<1x1x96xf32>
    %41 = vector.shape_cast %40 : vector<1x1x96xf32> to vector<1x96xf32>
    %42 = vector.broadcast %41 : vector<1x96xf32> to vector<16x96xf32>
    %43 = arith.addf %39, %42 : vector<16x96xf32>
    %44 = vector.shape_cast %43 : vector<16x96xf32> to vector<1x16x96xf32>
    %cst_21 = arith.constant 0.000000e+00 : f32
    %45 = vector.broadcast %cst_21 : f32 to vector<16x32xf32>
    %46 = vector.extract_strided_slice %44 {offsets = [0, 0, 0], sizes = [1, 16, 8], strides = [1, 1, 1]} : vector<1x16x96xf32> to vector<1x16x8xf32>
    %47 = vector.extract_strided_slice %44 {offsets = [0, 0, 32], sizes = [1, 16, 8], strides = [1, 1, 1]} : vector<1x16x96xf32> to vector<1x16x8xf32>
    %48 = vector.extract_strided_slice %44 {offsets = [0, 0, 64], sizes = [1, 16, 8], strides = [1, 1, 1]} : vector<1x16x96xf32> to vector<1x16x8xf32>
    "tpu.trace_start"() <{level = 10 : i32, message = "bld,bmd->blm"}> : () -> ()
    %cst_22 = arith.constant dense<0.000000e+00> : vector<1x16x16xf32>
    %49 = tpu.matmul %46, %47, %cst_22 {dimension_numbers = #tpu.dot_dimension_numbers<[2], [2], [1], [1], [0, 0, 0, 1, 1, 1], [0], [0]>} : vector<1x16x8xf32>, vector<1x16x8xf32>, vector<1x16x16xf32> -> vector<1x16x16xf32>
    "tpu.trace_stop"() : () -> ()
    %cst_23 = arith.constant 0.353553385 : f32
    %50 = vector.broadcast %cst_23 : f32 to vector<1x16x16xf32>
    %51 = arith.mulf %49, %50 : vector<1x16x16xf32>
    %52 = vector.shape_cast %9 : vector<16x16xf32> to vector<1x16x16xf32>
    %53 = arith.addf %51, %52 : vector<1x16x16xf32>
    %cst_24 = arith.constant dense<0xFF800000> : vector<1x16xf32>
    %54 = vector.multi_reduction <maximumf>, %53, %cst_24 [2] : vector<1x16x16xf32> to vector<1x16xf32>
    %55 = vector.shape_cast %54 : vector<1x16xf32> to vector<1x16x1xf32>
    %56 = vector.broadcast %55 : vector<1x16x1xf32> to vector<1x16x16xf32>
    %57 = arith.subf %53, %56 : vector<1x16x16xf32>
    %58 = math.exp %57 : vector<1x16x16xf32>
    %cst_25 = arith.constant dense<0.000000e+00> : vector<1x16xf32>
    %59 = vector.multi_reduction <add>, %58, %cst_25 [2] : vector<1x16x16xf32> to vector<1x16xf32>
    %60 = vector.shape_cast %59 : vector<1x16xf32> to vector<1x16x1xf32>
    %61 = tpu.reciprocal %60 {approx = true} : vector<1x16x1xf32> -> vector<1x16x1xf32>
    %62 = vector.broadcast %61 : vector<1x16x1xf32> to vector<1x16x16xf32>
    %63 = arith.mulf %58, %62 : vector<1x16x16xf32>
    "tpu.trace_start"() <{level = 10 : i32, message = "blm,bmd->bld"}> : () -> ()
    %cst_26 = arith.constant dense<0.000000e+00> : vector<1x16x8xf32>
    %64 = tpu.matmul %63, %48, %cst_26 {dimension_numbers = #tpu.dot_dimension_numbers<[2], [1], [1], [2], [0, 0, 0, 1, 1, 2], [0], [0]>} : vector<1x16x16xf32>, vector<1x16x8xf32>, vector<1x16x8xf32> -> vector<1x16x8xf32>
    "tpu.trace_stop"() : () -> ()
    %65 = vector.shape_cast %64 : vector<1x16x8xf32> to vector<16x8xf32>
    %66 = arith.truncf %65 : vector<16x8xf32> to vector<16x8xbf16>
    %c0_27 = arith.constant 0 : index
    %c0_28 = arith.constant 0 : index
    %c0_29 = arith.constant 0 : index
    %c0_30 = arith.constant 0 : index
    %67 = vector.load %arg11[%c0_27, %c0_28, %c0_29, %c0_30] : memref<1x4x8x32xbf16, #tpu.memory_space<vmem>>, vector<1x1x8x32xbf16>
    %68 = vector.shape_cast %67 : vector<1x1x8x32xbf16> to vector<8x32xbf16>
    %cst_31 = arith.constant dense<0.000000e+00> : vector<16x32xf32>
    %69 = tpu.matmul %66, %68, %cst_31 {dimension_numbers = #tpu.dot_dimension_numbers<[1], [0], [0], [1], [0, 0, 1, 1], [], []>} : vector<16x8xbf16>, vector<8x32xbf16>, vector<16x32xf32> -> vector<16x32xf32>
    %70 = arith.addf %45, %69 : vector<16x32xf32>
    %71 = vector.extract_strided_slice %44 {offsets = [0, 0, 8], sizes = [1, 16, 8], strides = [1, 1, 1]} : vector<1x16x96xf32> to vector<1x16x8xf32>
    %72 = vector.extract_strided_slice %44 {offsets = [0, 0, 40], sizes = [1, 16, 8], strides = [1, 1, 1]} : vector<1x16x96xf32> to vector<1x16x8xf32>
    %73 = vector.extract_strided_slice %44 {offsets = [0, 0, 72], sizes = [1, 16, 8], strides = [1, 1, 1]} : vector<1x16x96xf32> to vector<1x16x8xf32>
    "tpu.trace_start"() <{level = 10 : i32, message = "bld,bmd->blm"}> : () -> ()
    %cst_32 = arith.constant dense<0.000000e+00> : vector<1x16x16xf32>
    %74 = tpu.matmul %71, %72, %cst_32 {dimension_numbers = #tpu.dot_dimension_numbers<[2], [2], [1], [1], [0, 0, 0, 1, 1, 1], [0], [0]>} : vector<1x16x8xf32>, vector<1x16x8xf32>, vector<1x16x16xf32> -> vector<1x16x16xf32>
    "tpu.trace_stop"() : () -> ()
    %cst_33 = arith.constant 0.353553385 : f32
    %75 = vector.broadcast %cst_33 : f32 to vector<1x16x16xf32>
    %76 = arith.mulf %74, %75 : vector<1x16x16xf32>
    %77 = vector.shape_cast %9 : vector<16x16xf32> to vector<1x16x16xf32>
    %78 = arith.addf %76, %77 : vector<1x16x16xf32>
    %cst_34 = arith.constant dense<0xFF800000> : vector<1x16xf32>
    %79 = vector.multi_reduction <maximumf>, %78, %cst_34 [2] : vector<1x16x16xf32> to vector<1x16xf32>
    %80 = vector.shape_cast %79 : vector<1x16xf32> to vector<1x16x1xf32>
    %81 = vector.broadcast %80 : vector<1x16x1xf32> to vector<1x16x16xf32>
    %82 = arith.subf %78, %81 : vector<1x16x16xf32>
    %83 = math.exp %82 : vector<1x16x16xf32>
    %cst_35 = arith.constant dense<0.000000e+00> : vector<1x16xf32>
    %84 = vector.multi_reduction <add>, %83, %cst_35 [2] : vector<1x16x16xf32> to vector<1x16xf32>
    %85 = vector.shape_cast %84 : vector<1x16xf32> to vector<1x16x1xf32>
    %86 = tpu.reciprocal %85 {approx = true} : vector<1x16x1xf32> -> vector<1x16x1xf32>
    %87 = vector.broadcast %86 : vector<1x16x1xf32> to vector<1x16x16xf32>
    %88 = arith.mulf %83, %87 : vector<1x16x16xf32>
    "tpu.trace_start"() <{level = 10 : i32, message = "blm,bmd->bld"}> : () -> ()
    %cst_36 = arith.constant dense<0.000000e+00> : vector<1x16x8xf32>
    %89 = tpu.matmul %88, %73, %cst_36 {dimension_numbers = #tpu.dot_dimension_numbers<[2], [1], [1], [2], [0, 0, 0, 1, 1, 2], [0], [0]>} : vector<1x16x16xf32>, vector<1x16x8xf32>, vector<1x16x8xf32> -> vector<1x16x8xf32>
    "tpu.trace_stop"() : () -> ()
    %90 = vector.shape_cast %89 : vector<1x16x8xf32> to vector<16x8xf32>
    %91 = arith.truncf %90 : vector<16x8xf32> to vector<16x8xbf16>
    %c0_37 = arith.constant 0 : index
    %c1 = arith.constant 1 : index
    %c0_38 = arith.constant 0 : index
    %c0_39 = arith.constant 0 : index
    %92 = vector.load %arg11[%c0_37, %c1, %c0_38, %c0_39] : memref<1x4x8x32xbf16, #tpu.memory_space<vmem>>, vector<1x1x8x32xbf16>
    %93 = vector.shape_cast %92 : vector<1x1x8x32xbf16> to vector<8x32xbf16>
    %cst_40 = arith.constant dense<0.000000e+00> : vector<16x32xf32>
    %94 = tpu.matmul %91, %93, %cst_40 {dimension_numbers = #tpu.dot_dimension_numbers<[1], [0], [0], [1], [0, 0, 1, 1], [], []>} : vector<16x8xbf16>, vector<8x32xbf16>, vector<16x32xf32> -> vector<16x32xf32>
    %95 = arith.addf %70, %94 : vector<16x32xf32>
    %96 = vector.extract_strided_slice %44 {offsets = [0, 0, 16], sizes = [1, 16, 8], strides = [1, 1, 1]} : vector<1x16x96xf32> to vector<1x16x8xf32>
    %97 = vector.extract_strided_slice %44 {offsets = [0, 0, 48], sizes = [1, 16, 8], strides = [1, 1, 1]} : vector<1x16x96xf32> to vector<1x16x8xf32>
    %98 = vector.extract_strided_slice %44 {offsets = [0, 0, 80], sizes = [1, 16, 8], strides = [1, 1, 1]} : vector<1x16x96xf32> to vector<1x16x8xf32>
    "tpu.trace_start"() <{level = 10 : i32, message = "bld,bmd->blm"}> : () -> ()
    %cst_41 = arith.constant dense<0.000000e+00> : vector<1x16x16xf32>
    %99 = tpu.matmul %96, %97, %cst_41 {dimension_numbers = #tpu.dot_dimension_numbers<[2], [2], [1], [1], [0, 0, 0, 1, 1, 1], [0], [0]>} : vector<1x16x8xf32>, vector<1x16x8xf32>, vector<1x16x16xf32> -> vector<1x16x16xf32>
    "tpu.trace_stop"() : () -> ()
    %cst_42 = arith.constant 0.353553385 : f32
    %100 = vector.broadcast %cst_42 : f32 to vector<1x16x16xf32>
    %101 = arith.mulf %99, %100 : vector<1x16x16xf32>
    %102 = vector.shape_cast %9 : vector<16x16xf32> to vector<1x16x16xf32>
    %103 = arith.addf %101, %102 : vector<1x16x16xf32>
    %cst_43 = arith.constant dense<0xFF800000> : vector<1x16xf32>
    %104 = vector.multi_reduction <maximumf>, %103, %cst_43 [2] : vector<1x16x16xf32> to vector<1x16xf32>
    %105 = vector.shape_cast %104 : vector<1x16xf32> to vector<1x16x1xf32>
    %106 = vector.broadcast %105 : vector<1x16x1xf32> to vector<1x16x16xf32>
    %107 = arith.subf %103, %106 : vector<1x16x16xf32>
    %108 = math.exp %107 : vector<1x16x16xf32>
    %cst_44 = arith.constant dense<0.000000e+00> : vector<1x16xf32>
    %109 = vector.multi_reduction <add>, %108, %cst_44 [2] : vector<1x16x16xf32> to vector<1x16xf32>
    %110 = vector.shape_cast %109 : vector<1x16xf32> to vector<1x16x1xf32>
    %111 = tpu.reciprocal %110 {approx = true} : vector<1x16x1xf32> -> vector<1x16x1xf32>
    %112 = vector.broadcast %111 : vector<1x16x1xf32> to vector<1x16x16xf32>
    %113 = arith.mulf %108, %112 : vector<1x16x16xf32>
    "tpu.trace_start"() <{level = 10 : i32, message = "blm,bmd->bld"}> : () -> ()
    %cst_45 = arith.constant dense<0.000000e+00> : vector<1x16x8xf32>
    %114 = tpu.matmul %113, %98, %cst_45 {dimension_numbers = #tpu.dot_dimension_numbers<[2], [1], [1], [2], [0, 0, 0, 1, 1, 2], [0], [0]>} : vector<1x16x16xf32>, vector<1x16x8xf32>, vector<1x16x8xf32> -> vector<1x16x8xf32>
    "tpu.trace_stop"() : () -> ()
    %115 = vector.shape_cast %114 : vector<1x16x8xf32> to vector<16x8xf32>
    %116 = arith.truncf %115 : vector<16x8xf32> to vector<16x8xbf16>
    %c0_46 = arith.constant 0 : index
    %c2 = arith.constant 2 : index
    %c0_47 = arith.constant 0 : index
    %c0_48 = arith.constant 0 : index
    %117 = vector.load %arg11[%c0_46, %c2, %c0_47, %c0_48] : memref<1x4x8x32xbf16, #tpu.memory_space<vmem>>, vector<1x1x8x32xbf16>
    %118 = vector.shape_cast %117 : vector<1x1x8x32xbf16> to vector<8x32xbf16>
    %cst_49 = arith.constant dense<0.000000e+00> : vector<16x32xf32>
    %119 = tpu.matmul %116, %118, %cst_49 {dimension_numbers = #tpu.dot_dimension_numbers<[1], [0], [0], [1], [0, 0, 1, 1], [], []>} : vector<16x8xbf16>, vector<8x32xbf16>, vector<16x32xf32> -> vector<16x32xf32>
    %120 = arith.addf %95, %119 : vector<16x32xf32>
    %121 = vector.extract_strided_slice %44 {offsets = [0, 0, 24], sizes = [1, 16, 8], strides = [1, 1, 1]} : vector<1x16x96xf32> to vector<1x16x8xf32>
    %122 = vector.extract_strided_slice %44 {offsets = [0, 0, 56], sizes = [1, 16, 8], strides = [1, 1, 1]} : vector<1x16x96xf32> to vector<1x16x8xf32>
    %123 = vector.extract_strided_slice %44 {offsets = [0, 0, 88], sizes = [1, 16, 8], strides = [1, 1, 1]} : vector<1x16x96xf32> to vector<1x16x8xf32>
    "tpu.trace_start"() <{level = 10 : i32, message = "bld,bmd->blm"}> : () -> ()
    %cst_50 = arith.constant dense<0.000000e+00> : vector<1x16x16xf32>
    %124 = tpu.matmul %121, %122, %cst_50 {dimension_numbers = #tpu.dot_dimension_numbers<[2], [2], [1], [1], [0, 0, 0, 1, 1, 1], [0], [0]>} : vector<1x16x8xf32>, vector<1x16x8xf32>, vector<1x16x16xf32> -> vector<1x16x16xf32>
    "tpu.trace_stop"() : () -> ()
    %cst_51 = arith.constant 0.353553385 : f32
    %125 = vector.broadcast %cst_51 : f32 to vector<1x16x16xf32>
    %126 = arith.mulf %124, %125 : vector<1x16x16xf32>
    %127 = vector.shape_cast %9 : vector<16x16xf32> to vector<1x16x16xf32>
    %128 = arith.addf %126, %127 : vector<1x16x16xf32>
    %cst_52 = arith.constant dense<0xFF800000> : vector<1x16xf32>
    %129 = vector.multi_reduction <maximumf>, %128, %cst_52 [2] : vector<1x16x16xf32> to vector<1x16xf32>
    %130 = vector.shape_cast %129 : vector<1x16xf32> to vector<1x16x1xf32>
    %131 = vector.broadcast %130 : vector<1x16x1xf32> to vector<1x16x16xf32>
    %132 = arith.subf %128, %131 : vector<1x16x16xf32>
    %133 = math.exp %132 : vector<1x16x16xf32>
    %cst_53 = arith.constant dense<0.000000e+00> : vector<1x16xf32>
    %134 = vector.multi_reduction <add>, %133, %cst_53 [2] : vector<1x16x16xf32> to vector<1x16xf32>
    %135 = vector.shape_cast %134 : vector<1x16xf32> to vector<1x16x1xf32>
    %136 = tpu.reciprocal %135 {approx = true} : vector<1x16x1xf32> -> vector<1x16x1xf32>
    %137 = vector.broadcast %136 : vector<1x16x1xf32> to vector<1x16x16xf32>
    %138 = arith.mulf %133, %137 : vector<1x16x16xf32>
    "tpu.trace_start"() <{level = 10 : i32, message = "blm,bmd->bld"}> : () -> ()
    %cst_54 = arith.constant dense<0.000000e+00> : vector<1x16x8xf32>
    %139 = tpu.matmul %138, %123, %cst_54 {dimension_numbers = #tpu.dot_dimension_numbers<[2], [1], [1], [2], [0, 0, 0, 1, 1, 2], [0], [0]>} : vector<1x16x16xf32>, vector<1x16x8xf32>, vector<1x16x8xf32> -> vector<1x16x8xf32>
    "tpu.trace_stop"() : () -> ()
    %140 = vector.shape_cast %139 : vector<1x16x8xf32> to vector<16x8xf32>
    %141 = arith.truncf %140 : vector<16x8xf32> to vector<16x8xbf16>
    %c0_55 = arith.constant 0 : index
    %c3 = arith.constant 3 : index
    %c0_56 = arith.constant 0 : index
    %c0_57 = arith.constant 0 : index
    %142 = vector.load %arg11[%c0_55, %c3, %c0_56, %c0_57] : memref<1x4x8x32xbf16, #tpu.memory_space<vmem>>, vector<1x1x8x32xbf16>
    %143 = vector.shape_cast %142 : vector<1x1x8x32xbf16> to vector<8x32xbf16>
    %cst_58 = arith.constant dense<0.000000e+00> : vector<16x32xf32>
    %144 = tpu.matmul %141, %143, %cst_58 {dimension_numbers = #tpu.dot_dimension_numbers<[1], [0], [0], [1], [0, 0, 1, 1], [], []>} : vector<16x8xbf16>, vector<8x32xbf16>, vector<16x32xf32> -> vector<16x32xf32>
    %145 = arith.addf %120, %144 : vector<16x32xf32>
    %146 = arith.addf %3, %145 : vector<16x32xf32>
    %c0_59 = arith.constant 0 : index
    %c0_60 = arith.constant 0 : index
    %c0_61 = arith.constant 0 : index
    %147 = vector.load %arg12[%c0_59, %c0_60, %c0_61] : memref<1x1x32xf32, #tpu.memory_space<vmem>>, vector<1x1x32xf32>
    %148 = vector.shape_cast %147 : vector<1x1x32xf32> to vector<1x32xf32>
    %149 = vector.broadcast %148 : vector<1x32xf32> to vector<16x32xf32>
    %150 = arith.addf %146, %149 : vector<16x32xf32>
    %c0_62 = arith.constant 0 : index
    %c0_63 = arith.constant 0 : index
    %c0_64 = arith.constant 0 : index
    %151 = vector.load %arg13[%c0_62, %c0_63, %c0_64] : memref<1x1x32xf32, #tpu.memory_space<vmem>>, vector<1x1x32xf32>
    %152 = vector.shape_cast %151 : vector<1x1x32xf32> to vector<1x32xf32>
    %c0_65 = arith.constant 0 : index
    %c0_66 = arith.constant 0 : index
    %c0_67 = arith.constant 0 : index
    %153 = vector.load %arg14[%c0_65, %c0_66, %c0_67] : memref<1x1x32xf32, #tpu.memory_space<vmem>>, vector<1x1x32xf32>
    %154 = vector.shape_cast %153 : vector<1x1x32xf32> to vector<1x32xf32>
    %cst_68 = arith.constant dense<0.000000e+00> : vector<16xf32>
    %155 = vector.multi_reduction <add>, %150, %cst_68 [1] : vector<16x32xf32> to vector<16xf32>
    %156 = vector.shape_cast %155 : vector<16xf32> to vector<16x1xf32>
    %cst_69 = arith.constant 3.200000e+01 : f32
    %157 = vector.broadcast %cst_69 : f32 to vector<16x1xf32>
    %158 = arith.divf %156, %157 : vector<16x1xf32>
    %159 = vector.broadcast %158 : vector<16x1xf32> to vector<16x32xf32>
    %160 = arith.subf %150, %159 : vector<16x32xf32>
    %161 = arith.mulf %160, %160 : vector<16x32xf32>
    %cst_70 = arith.constant dense<0.000000e+00> : vector<16xf32>
    %162 = vector.multi_reduction <add>, %161, %cst_70 [1] : vector<16x32xf32> to vector<16xf32>
    %163 = vector.shape_cast %162 : vector<16xf32> to vector<16x1xf32>
    %cst_71 = arith.constant 3.200000e+01 : f32
    %164 = vector.broadcast %cst_71 : f32 to vector<16x1xf32>
    %165 = arith.divf %163, %164 : vector<16x1xf32>
    %166 = vector.broadcast %158 : vector<16x1xf32> to vector<16x32xf32>
    %167 = arith.subf %150, %166 : vector<16x32xf32>
    %cst_72 = arith.constant 9.99999974E-6 : f32
    %168 = vector.broadcast %cst_72 : f32 to vector<16x1xf32>
    %169 = arith.addf %165, %168 : vector<16x1xf32>
    %170 = math.rsqrt %169 : vector<16x1xf32>
    %171 = vector.broadcast %170 : vector<16x1xf32> to vector<16x32xf32>
    %172 = arith.mulf %167, %171 : vector<16x32xf32>
    %173 = vector.broadcast %152 : vector<1x32xf32> to vector<16x32xf32>
    %174 = arith.mulf %172, %173 : vector<16x32xf32>
    %175 = vector.broadcast %154 : vector<1x32xf32> to vector<16x32xf32>
    %176 = arith.addf %174, %175 : vector<16x32xf32>
    %177 = arith.truncf %176 : vector<16x32xf32> to vector<16x32xbf16>
    %c0_73 = arith.constant 0 : index
    %c0_74 = arith.constant 0 : index
    %c0_75 = arith.constant 0 : index
    %178 = vector.load %arg15[%c0_73, %c0_74, %c0_75] : memref<1x32x128xbf16, #tpu.memory_space<vmem>>, vector<1x32x128xbf16>
    %179 = vector.shape_cast %178 : vector<1x32x128xbf16> to vector<32x128xbf16>
    %cst_76 = arith.constant dense<0.000000e+00> : vector<16x128xf32>
    %180 = tpu.matmul %177, %179, %cst_76 {dimension_numbers = #tpu.dot_dimension_numbers<[1], [0], [0], [1], [0, 0, 1, 1], [], []>} : vector<16x32xbf16>, vector<32x128xbf16>, vector<16x128xf32> -> vector<16x128xf32>
    %c0_77 = arith.constant 0 : index
    %c0_78 = arith.constant 0 : index
    %c0_79 = arith.constant 0 : index
    %181 = vector.load %arg16[%c0_77, %c0_78, %c0_79] : memref<1x1x128xf32, #tpu.memory_space<vmem>>, vector<1x1x128xf32>
    %182 = vector.shape_cast %181 : vector<1x1x128xf32> to vector<1x128xf32>
    %183 = vector.broadcast %182 : vector<1x128xf32> to vector<16x128xf32>
    %184 = arith.addf %180, %183 : vector<16x128xf32>
    %cst_80 = arith.constant 5.000000e-01 : f32
    %185 = vector.broadcast %cst_80 : f32 to vector<16x128xf32>
    %186 = arith.mulf %185, %184 : vector<16x128xf32>
    %cst_81 = arith.constant 0.707106769 : f32
    %187 = vector.broadcast %cst_81 : f32 to vector<16x128xf32>
    %188 = arith.mulf %184, %187 : vector<16x128xf32>
    %cst_82 = arith.constant 0.000000e+00 : f32
    %189 = vector.broadcast %cst_82 : f32 to vector<16x128xf32>
    %190 = arith.cmpf oge, %188, %189 : vector<16x128xf32>
    %cst_83 = arith.constant 1.000000e+00 : f32
    %cst_84 = arith.constant -1.000000e+00 : f32
    %191 = vector.broadcast %cst_83 : f32 to vector<16x128xf32>
    %192 = vector.broadcast %cst_84 : f32 to vector<16x128xf32>
    %193 = arith.select %190, %191, %192 : vector<16x128xi1>, vector<16x128xf32>
    %194 = math.absf %188 : vector<16x128xf32>
    %cst_85 = arith.constant 0.327591091 : f32
    %195 = vector.broadcast %cst_85 : f32 to vector<16x128xf32>
    %196 = arith.mulf %195, %194 : vector<16x128xf32>
    %cst_86 = arith.constant 1.000000e+00 : f32
    %197 = vector.broadcast %cst_86 : f32 to vector<16x128xf32>
    %198 = arith.addf %197, %196 : vector<16x128xf32>
    %cst_87 = arith.constant 1.000000e+00 : f32
    %199 = vector.broadcast %cst_87 : f32 to vector<16x128xf32>
    %200 = arith.divf %199, %198 : vector<16x128xf32>
    %cst_88 = arith.constant 1.06140542 : f32
    %201 = vector.broadcast %cst_88 : f32 to vector<16x128xf32>
    %202 = arith.mulf %201, %200 : vector<16x128xf32>
    %cst_89 = arith.constant -1.45315206 : f32
    %203 = vector.broadcast %cst_89 : f32 to vector<16x128xf32>
    %204 = arith.addf %202, %203 : vector<16x128xf32>
    %205 = arith.mulf %204, %200 : vector<16x128xf32>
    %cst_90 = arith.constant 1.42141378 : f32
    %206 = vector.broadcast %cst_90 : f32 to vector<16x128xf32>
    %207 = arith.addf %205, %206 : vector<16x128xf32>
    %208 = arith.mulf %207, %200 : vector<16x128xf32>
    %cst_91 = arith.constant -0.284496725 : f32
    %209 = vector.broadcast %cst_91 : f32 to vector<16x128xf32>
    %210 = arith.addf %208, %209 : vector<16x128xf32>
    %211 = arith.mulf %210, %200 : vector<16x128xf32>
    %cst_92 = arith.constant 0.254829586 : f32
    %212 = vector.broadcast %cst_92 : f32 to vector<16x128xf32>
    %213 = arith.addf %211, %212 : vector<16x128xf32>
    %214 = arith.mulf %213, %200 : vector<16x128xf32>
    %cst_93 = arith.constant 0.000000e+00 : f32
    %215 = vector.broadcast %cst_93 : f32 to vector<16x128xf32>
    %216 = arith.subf %215, %194 : vector<16x128xf32>
    %217 = arith.mulf %216, %194 : vector<16x128xf32>
    %218 = math.exp %217 : vector<16x128xf32>
    %219 = arith.mulf %214, %218 : vector<16x128xf32>
    %cst_94 = arith.constant 1.000000e+00 : f32
    %220 = vector.broadcast %cst_94 : f32 to vector<16x128xf32>
    %221 = arith.subf %220, %219 : vector<16x128xf32>
    %222 = arith.mulf %193, %221 : vector<16x128xf32>
    %cst_95 = arith.constant 1.000000e+00 : f32
    %223 = vector.broadcast %cst_95 : f32 to vector<16x128xf32>
    %224 = arith.addf %223, %222 : vector<16x128xf32>
    %225 = arith.mulf %186, %224 : vector<16x128xf32>
    %226 = arith.truncf %225 : vector<16x128xf32> to vector<16x128xbf16>
    %c0_96 = arith.constant 0 : index
    %c0_97 = arith.constant 0 : index
    %c0_98 = arith.constant 0 : index
    %227 = vector.load %arg17[%c0_96, %c0_97, %c0_98] : memref<1x128x32xbf16, #tpu.memory_space<vmem>>, vector<1x128x32xbf16>
    %228 = vector.shape_cast %227 : vector<1x128x32xbf16> to vector<128x32xbf16>
    %cst_99 = arith.constant dense<0.000000e+00> : vector<16x32xf32>
    %229 = tpu.matmul %226, %228, %cst_99 {dimension_numbers = #tpu.dot_dimension_numbers<[1], [0], [0], [1], [0, 0, 1, 1], [], []>} : vector<16x128xbf16>, vector<128x32xbf16>, vector<16x32xf32> -> vector<16x32xf32>
    %c0_100 = arith.constant 0 : index
    %c0_101 = arith.constant 0 : index
    %c0_102 = arith.constant 0 : index
    %230 = vector.load %arg18[%c0_100, %c0_101, %c0_102] : memref<1x1x32xf32, #tpu.memory_space<vmem>>, vector<1x1x32xf32>
    %231 = vector.shape_cast %230 : vector<1x1x32xf32> to vector<1x32xf32>
    %232 = vector.broadcast %231 : vector<1x32xf32> to vector<16x32xf32>
    %233 = arith.addf %229, %232 : vector<16x32xf32>
    %234 = arith.addf %150, %233 : vector<16x32xf32>
    %c0_103 = arith.constant 0 : index
    %c0_104 = arith.constant 0 : index
    %235 = vector.load %arg24[%c0_103, %c0_104] : memref<16x32xf32, #tpu.memory_space<vmem>>, vector<16x32xf32>
    tpu.vector_store %arg24[%c0_103, %c0_104], %234 {strides = array<i32>} : memref<16x32xf32, #tpu.memory_space<vmem>>, vector<16x32xf32>,
    %c1_i32 = arith.constant 1 : i32
    %236 = arith.cmpi eq, %arg1, %c1_i32 : i32
    %237 = arith.extui %236 : i1 to i32
    %c0_i32_105 = arith.constant 0 : i32
    %238 = arith.cmpi ne, %237, %c0_i32_105 : i32
    scf.if %238 {
      %c0_106 = arith.constant 0 : index
      %c0_107 = arith.constant 0 : index
      %239 = vector.load %arg19[%c0_106, %c0_107] : memref<1x32xf32, #tpu.memory_space<vmem>>, vector<1x32xf32>
      %c0_108 = arith.constant 0 : index
      %c0_109 = arith.constant 0 : index
      %240 = vector.load %arg20[%c0_108, %c0_109] : memref<1x32xf32, #tpu.memory_space<vmem>>, vector<1x32xf32>
      %cst_110 = arith.constant dense<0.000000e+00> : vector<16xf32>
      %241 = vector.multi_reduction <add>, %234, %cst_110 [1] : vector<16x32xf32> to vector<16xf32>
      %242 = vector.shape_cast %241 : vector<16xf32> to vector<16x1xf32>
      %cst_111 = arith.constant 3.200000e+01 : f32
      %243 = vector.broadcast %cst_111 : f32 to vector<16x1xf32>
      %244 = arith.divf %242, %243 : vector<16x1xf32>
      %245 = vector.broadcast %244 : vector<16x1xf32> to vector<16x32xf32>
      %246 = arith.subf %234, %245 : vector<16x32xf32>
      %247 = arith.mulf %246, %246 : vector<16x32xf32>
      %cst_112 = arith.constant dense<0.000000e+00> : vector<16xf32>
      %248 = vector.multi_reduction <add>, %247, %cst_112 [1] : vector<16x32xf32> to vector<16xf32>
      %249 = vector.shape_cast %248 : vector<16xf32> to vector<16x1xf32>
      %cst_113 = arith.constant 3.200000e+01 : f32
      %250 = vector.broadcast %cst_113 : f32 to vector<16x1xf32>
      %251 = arith.divf %249, %250 : vector<16x1xf32>
      %252 = vector.broadcast %244 : vector<16x1xf32> to vector<16x32xf32>
      %253 = arith.subf %234, %252 : vector<16x32xf32>
      %cst_114 = arith.constant 9.99999974E-6 : f32
      %254 = vector.broadcast %cst_114 : f32 to vector<16x1xf32>
      %255 = arith.addf %251, %254 : vector<16x1xf32>
      %256 = math.rsqrt %255 : vector<16x1xf32>
      %257 = vector.broadcast %256 : vector<16x1xf32> to vector<16x32xf32>
      %258 = arith.mulf %253, %257 : vector<16x32xf32>
      %259 = vector.broadcast %239 : vector<1x32xf32> to vector<16x32xf32>
      %260 = arith.mulf %258, %259 : vector<16x32xf32>
      %261 = vector.broadcast %240 : vector<1x32xf32> to vector<16x32xf32>
      %262 = arith.addf %260, %261 : vector<16x32xf32>
      %c0_115 = arith.constant 0 : index
      %c0_116 = arith.constant 0 : index
      %263 = vector.load %arg21[%c0_115, %c0_116] : memref<32x9xf32, #tpu.memory_space<vmem>>, vector<32x9xf32>
      %cst_117 = arith.constant dense<0.000000e+00> : vector<16x9xf32>
      %264 = tpu.matmul %262, %263, %cst_117 {dimension_numbers = #tpu.dot_dimension_numbers<[1], [0], [0], [1], [0, 0, 1, 1], [], []>} : vector<16x32xf32>, vector<32x9xf32>, vector<16x9xf32> -> vector<16x9xf32>
      %c0_118 = arith.constant 0 : index
      %c0_119 = arith.constant 0 : index
      %265 = vector.load %arg22[%c0_118, %c0_119] : memref<1x9xf32, #tpu.memory_space<vmem>>, vector<1x9xf32>
      %266 = vector.broadcast %265 : vector<1x9xf32> to vector<16x9xf32>
      %267 = arith.addf %264, %266 : vector<16x9xf32>
      %c0_120 = arith.constant 0 : index
      %c0_121 = arith.constant 0 : index
      %268 = vector.load %arg23[%c0_120, %c0_121] : memref<16x9xf32, #tpu.memory_space<vmem>>, vector<16x9xf32>
      tpu.vector_store %arg23[%c0_120, %c0_121], %267 {strides = array<i32>} : memref<16x9xf32, #tpu.memory_space<vmem>>, vector<16x9xf32>,
    } else {
    }
    return
  }
  func.func @transform_0(%arg0: i32, %arg1: i32) -> (i32, i32) {
    %c0_i32 = arith.constant 0 : i32
    %c0_i32_0 = arith.constant 0 : i32
    return %arg0, %c0_i32 : i32, i32
  }
  func.func @transform_1(%arg0: i32, %arg1: i32) -> (i32, i32) {
    %c0_i32 = arith.constant 0 : i32
    %c0_i32_0 = arith.constant 0 : i32
    return %arg0, %c0_i32 : i32, i32
  }
  func.func @transform_2(%arg0: i32, %arg1: i32) -> (i32, i32) {
    %c0_i32 = arith.constant 0 : i32
    %c0_i32_0 = arith.constant 0 : i32
    %c0_i32_1 = arith.constant 0 : i32
    return %c0_i32, %c0_i32_0 : i32, i32
  }
  func.func @transform_3(%arg0: i32, %arg1: i32) -> (i32, i32) {
    %c0_i32 = arith.constant 0 : i32
    %c0_i32_0 = arith.constant 0 : i32
    %c0_i32_1 = arith.constant 0 : i32
    return %c0_i32, %c0_i32_0 : i32, i32
  }
  func.func @transform_4(%arg0: i32, %arg1: i32) -> (i32, i32) {
    %c0_i32 = arith.constant 0 : i32
    %c0_i32_0 = arith.constant 0 : i32
    %c0_i32_1 = arith.constant 0 : i32
    return %c0_i32, %c0_i32_0 : i32, i32
  }
  func.func @transform_5(%arg0: i32, %arg1: i32) -> (i32, i32, i32) {
    %c0_i32 = arith.constant 0 : i32
    %c0_i32_0 = arith.constant 0 : i32
    %c0_i32_1 = arith.constant 0 : i32
    return %arg1, %c0_i32, %c0_i32_0 : i32, i32, i32
  }
  func.func @transform_6(%arg0: i32, %arg1: i32) -> (i32, i32, i32) {
    %c0_i32 = arith.constant 0 : i32
    %c0_i32_0 = arith.constant 0 : i32
    %c0_i32_1 = arith.constant 0 : i32
    return %arg1, %c0_i32, %c0_i32_0 : i32, i32, i32
  }
  func.func @transform_7(%arg0: i32, %arg1: i32) -> (i32, i32, i32) {
    %c0_i32 = arith.constant 0 : i32
    %c0_i32_0 = arith.constant 0 : i32
    %c0_i32_1 = arith.constant 0 : i32
    return %arg1, %c0_i32, %c0_i32_0 : i32, i32, i32
  }
  func.func @transform_8(%arg0: i32, %arg1: i32) -> (i32, i32, i32) {
    %c0_i32 = arith.constant 0 : i32
    %c0_i32_0 = arith.constant 0 : i32
    %c0_i32_1 = arith.constant 0 : i32
    return %arg1, %c0_i32, %c0_i32_0 : i32, i32, i32
  }
  func.func @transform_9(%arg0: i32, %arg1: i32) -> (i32, i32, i32, i32) {
    %c0_i32 = arith.constant 0 : i32
    %c0_i32_0 = arith.constant 0 : i32
    %c0_i32_1 = arith.constant 0 : i32
    %c0_i32_2 = arith.constant 0 : i32
    return %arg1, %c0_i32, %c0_i32_0, %c0_i32_1 : i32, i32, i32, i32
  }
  func.func @transform_10(%arg0: i32, %arg1: i32) -> (i32, i32, i32) {
    %c0_i32 = arith.constant 0 : i32
    %c0_i32_0 = arith.constant 0 : i32
    %c0_i32_1 = arith.constant 0 : i32
    return %arg1, %c0_i32, %c0_i32_0 : i32, i32, i32
  }
  func.func @transform_11(%arg0: i32, %arg1: i32) -> (i32, i32, i32) {
    %c0_i32 = arith.constant 0 : i32
    %c0_i32_0 = arith.constant 0 : i32
    %c0_i32_1 = arith.constant 0 : i32
    return %arg1, %c0_i32, %c0_i32_0 : i32, i32, i32
  }
  func.func @transform_12(%arg0: i32, %arg1: i32) -> (i32, i32, i32) {
    %c0_i32 = arith.constant 0 : i32
    %c0_i32_0 = arith.constant 0 : i32
    %c0_i32_1 = arith.constant 0 : i32
    return %arg1, %c0_i32, %c0_i32_0 : i32, i32, i32
  }
  func.func @transform_13(%arg0: i32, %arg1: i32) -> (i32, i32, i32) {
    %c0_i32 = arith.constant 0 : i32
    %c0_i32_0 = arith.constant 0 : i32
    %c0_i32_1 = arith.constant 0 : i32
    return %arg1, %c0_i32, %c0_i32_0 : i32, i32, i32
  }
  func.func @transform_14(%arg0: i32, %arg1: i32) -> (i32, i32, i32) {
    %c0_i32 = arith.constant 0 : i32
    %c0_i32_0 = arith.constant 0 : i32
    %c0_i32_1 = arith.constant 0 : i32
    return %arg1, %c0_i32, %c0_i32_0 : i32, i32, i32
  }
  func.func @transform_15(%arg0: i32, %arg1: i32) -> (i32, i32, i32) {
    %c0_i32 = arith.constant 0 : i32
    %c0_i32_0 = arith.constant 0 : i32
    %c0_i32_1 = arith.constant 0 : i32
    return %arg1, %c0_i32, %c0_i32_0 : i32, i32, i32
  }
  func.func @transform_16(%arg0: i32, %arg1: i32) -> (i32, i32, i32) {
    %c0_i32 = arith.constant 0 : i32
    %c0_i32_0 = arith.constant 0 : i32
    %c0_i32_1 = arith.constant 0 : i32
    return %arg1, %c0_i32, %c0_i32_0 : i32, i32, i32
  }
  func.func @transform_17(%arg0: i32, %arg1: i32) -> (i32, i32) {
    %c0_i32 = arith.constant 0 : i32
    %c0_i32_0 = arith.constant 0 : i32
    %c0_i32_1 = arith.constant 0 : i32
    return %c0_i32, %c0_i32_0 : i32, i32
  }
  func.func @transform_18(%arg0: i32, %arg1: i32) -> (i32, i32) {
    %c0_i32 = arith.constant 0 : i32
    %c0_i32_0 = arith.constant 0 : i32
    %c0_i32_1 = arith.constant 0 : i32
    return %c0_i32, %c0_i32_0 : i32, i32
  }
  func.func @transform_19(%arg0: i32, %arg1: i32) -> (i32, i32) {
    %c0_i32 = arith.constant 0 : i32
    %c0_i32_0 = arith.constant 0 : i32
    %c0_i32_1 = arith.constant 0 : i32
    return %c0_i32, %c0_i32_0 : i32, i32
  }
  func.func @transform_20(%arg0: i32, %arg1: i32) -> (i32, i32) {
    %c0_i32 = arith.constant 0 : i32
    %c0_i32_0 = arith.constant 0 : i32
    %c0_i32_1 = arith.constant 0 : i32
    return %c0_i32, %c0_i32_0 : i32, i32
  }
  func.func @transform_21(%arg0: i32, %arg1: i32) -> (i32, i32) {
    %c0_i32 = arith.constant 0 : i32
    %c0_i32_0 = arith.constant 0 : i32
    return %arg0, %c0_i32 : i32, i32
  }
}

</mosaic_0001>

<bundles_post_ra>
// kernel: cdt_forward.1
= control target key start
LH: loop header
LB: loop body
LE: loop exit
PB: predicated region body
PF: predicated region fallthrough
CT: control target
= control target key end

     0   :  { %s3392_s25 = smov 0   ;;  %s3394_s26 = smov 0   ;;  %s3787_s0 = inlined_call_operand.vmem [shape: f32[32,9], index: 0, kind: input, shape index: {}]   ;;  %s3788_s1 = inlined_call_operand.vmem [shape: f32[32,32], index: 1, kind: input, shape index: {}]   ;;  %s3789_s2 = inlined_call_operand.vmem [shape: f32[9,32], index: 2, kind: input, shape index: {}]   ;;  %s3790_s3 = inlined_call_operand.vmem [shape: f32[1,32], index: 3, kind: input, shape index: {}]   ;;  %s3791_s4 = inlined_call_operand.vmem [shape: f32[1,32], index: 4, kind: input, shape index: {}]   ;;  %s3792_s5 = inlined_call_operand.vmem [shape: f32[2,1,32], index: 5, kind: input, shape index: {}]   ;;  %s3793_s6 = inlined_call_operand.vmem [shape: f32[2,1,32], index: 6, kind: input, shape index: {}]   ;;  %s3794_s7 = inlined_call_operand.vmem [shape: bf16[2,32,96], index: 7, kind: input, shape index: {}]   ;;  %s3795_s8 = inlined_call_operand.vmem [shape: f32[2,1,96], index: 8, kind: input, shape index: {}]   ;;  %s3796_s9 = inlined_call_operand.vmem [shape: bf16[2,4,8,32], index: 9, kind: input, shape index: {}]   ;;  %s3797_s10 = inlined_call_operand.vmem [shape: f32[2,1,32], index: 10, kind: input, shape index: {}]   ;;  %s3798_s11 = inlined_call_operand.vmem [shape: f32[2,1,32], index: 11, kind: input, shape index: {}]   ;;  %s3799_s12 = inlined_call_operand.vmem [shape: f32[2,1,32], index: 12, kind: input, shape index: {}]   ;;  %s3800_s13 = inlined_call_operand.vmem [shape: bf16[2,32,128], index: 13, kind: input, shape index: {}]   ;;  %s3801_s14 = inlined_call_operand.vmem [shape: f32[2,1,128], index: 14, kind: input, shape index: {}]   ;;  %s3802_s15 = inlined_call_operand.vmem [shape: bf16[2,128,32], index: 15, kind: input, shape index: {}]   ;;  %s3803_s16 = inlined_call_operand.vmem [shape: f32[2,1,32], index: 16, kind: input, shape index: {}]   ;;  %s3804_s17 = inlined_call_operand.vmem [shape: f32[1,32], index: 17, kind: input, shape index: {}]   ;;  %s3805_s18 = inlined_call_operand.vmem [shape: f32[1,32], index: 18, kind: input, shape index: {}]   ;;  %s3806_s19 = inlined_call_operand.vmem [shape: f32[32,9], index: 19, kind: input, shape index: {}]   ;;  %s3807_s20 = inlined_call_operand.vmem [shape: f32[1,9], index: 20, kind: input, shape index: {}]   ;;  %s3808_s21 = inlined_call_operand.vmem [shape: f32[32,9], index: 21, kind: output, shape index: {}]  }
   0x1   :  { %3815 = sst [smem:[#allocation9_spill]] %s3787_s0  ;;  %s3396_s27 = smov 0  }
   0x2   :  { %3816 = sst [smem:[#allocation10_spill]] %s3788_s1 }
   0x3   :  { %3817 = sst [smem:[#allocation11_spill]] %s3789_s2  ;;  %s3390_s2 = smov 0  }
   0x4   :  { %3818 = sst [smem:[#allocation12_spill]] %s3790_s3  ;;  %s3398_s3 = smov 0  }
   0x5   :  { %3819 = sst [smem:[#allocation13_spill]] %s3791_s4 }
   0x6   :  { %3820 = sst [smem:[#allocation14_spill]] %s3792_s5 }
   0x7   :  { %3821 = sst [smem:[#allocation15_spill]] %s3794_s7 }
   0x8   :  { %3822 = sst [smem:[#allocation16_spill]] %s3796_s9 }
   0x9   :  { %3823 = sst [smem:[#allocation17_spill]] %s3798_s11 }
   0xa   :  { %3824 = sst [smem:[#allocation18_spill]] %s3802_s15 }
   0xb   :  { %3825 = sst [smem:[#allocation19_spill]] %s3804_s17 }
   0xc   :  { %3826 = sst [smem:[#allocation20_spill]] %s3805_s18 }
   0xd   :  { %3827 = sst [smem:[#allocation21_spill]] %s3806_s19 }
   0xe   :  { %3828 = sst [smem:[#allocation22_spill]] %s3807_s20 }
   0xf   :  { %3829 = sst [smem:[#allocation23_spill]] %s3808_s21 }
  0x10 LB: > { %3830 = sst [smem:[#allocation3_spill]] %s3247_s2  ;;  %s40_s28 = sadd.s32 1, %s3255_s26  ;;  %s3263_s3 = sphi %s3398_s3, %s31_s3   ;;  %s3259_s27 = sphi %s3396_s27, %s3865_s27   ;;  %s3255_s26 = sphi %s3394_s26, %s3864_s26   ;;  %s3251_s25 = sphi %s3392_s25, %s3863_s25   ;;  %s3247_s2 = sphi %s3390_s2, %s3862_s2  }
  0x11   : > { %3831 = sst [smem:[#allocation4_spill]] %s3255_s26  ;;  %s43_s29 = sadd.s32 1, %s3259_s27 }
  0x12   : > { %3832 = sst [smem:[#allocation5_spill]] %s3259_s27  ;;  %p41_p0 = scmp.ge.s32.totalorder %s40_s28, 2 }
  0x13   : > { %3833 = sst [smem:[#allocation6_spill]] %s3263_s3  ;;  %p2817_p1 = scmp.ge.s32.totalorder %s3263_s3, 1 }
  0x14   : > { %p715_p2 = scmp.lt.s32.totalorder %s3263_s3, 5  ;;  %s3867_s28 = smov (%p41_p0, %s40_s28), 0 }
  0x15   : > { %3834 = sst [smem:[#allocation7_spill]] %s3867_s28  ;;  %s3869_s29 = smov (!%p41_p0, %s43_s29), %s3259_s27 }
  0x16   : > { %p716_p3 = pnand %p2817_p1, %p715_p2  ;;  %p45_p4 = scmp.ge.s32.totalorder %s3869_s29, 2 }
  0x17   : > { %s2818_s0 = sshll.u32 (!%p716_p3), %s3251_s25, 1  ;;  %p836_p5 = scmp.lt.s32.totalorder (!%p716_p3), %s3247_s2, 1 }
  0x18   : > { %s3871_s29 = smov (%p45_p4, %s3869_s29), 0  ;;  %719 = sbr.rel (%p716_p3) target bundleno = 5153 (0x1421), region = 104 }
  0x19   : > { %3835 = sst [smem:[#allocation8_spill]] %s3871_s29  ;;  %p825_p6 = scmp.lt.s32.totalorder (!%p716_p3), %s2818_s0, 3 }
  0x1a   : > { %s3837_s3 = sld [smem:[#allocation9_spill]] (!%p716_p3) }
  0x1b   : > { %s3838_s19 = sld [smem:[#allocation10_spill]] (!%p716_p3) }
  0x1c   : > { %s3839_s7 = sld [smem:[#allocation15_spill]] (!%p716_p3) }
  0x1d   : > { %s3424_s4 = scalar_select %p836_p5, %s3247_s2, 1 }
  0x1e   : > { %s3873_s0 = smov (!%p825_p6, %s2818_s0), 3  ;;  %s3840_s9 = sld [smem:[#allocation16_spill]] }
  0x1f   : > { %s2819_s29 = sshll.u32 %s3873_s0, 3  ;;  %s2899_s28 = sshll.u32 %s3424_s4, 4 }
  0x20   : > { %s828_s20 = scalar_lea.vmem %s3837_s3, %s2819_s29  ;;  %s3470_s22 = scalar_lea.vmem %s3800_s13, %s2899_s28 }
  0x21   : > { %s834_s2 = scalar_lea.vmem %s3838_s19, %s2819_s29  ;;  %s871_s1 = scalar_lea.vmem %s3801_s14, %s3424_s4 }
  0x22   : > { %s3444_s30 = scalar_lea.vmem %s3839_s7, %s2899_s28  ;;  %s879_s3 = scalar_lea.vmem %s3803_s16, %s3424_s4 }
  0x23   : > { %s3842_s19 = sld [smem:[#allocation18_spill]] }
  0x24   : > { %s3453_s25 = scalar_lea.vmem %s3840_s9, %s2899_s28  ;;  %s2902_s9 = sshll.u32 %s3424_s4, 6 }
  0x25   : > { %s3843_s23 = sld [smem:[#allocation23_spill]] }
  0x26   : > { %s3844_s28 = sld [smem:[#allocation3_spill]] }
  0x29   : > { %s3484_s11 = scalar_lea.vmem %s3842_s19, %s2902_s9 }
  0x2b   : > { %s3489_s7 = scalar_lea.vmem %s3843_s23, %s2819_s29 }
  0x2c   : > { %p2832_p7 = scmp.ne.s32.totalorder %s3844_s28, 0 }
  0x2d   : > { %s3845_s0 = sld [smem:[#allocation11_spill]] (!%p2832_p7) }
  0x2e   : > { %890 = sbr.rel (%p2832_p7) target bundleno = 566 (0x236), region = 108  ;;  %s3847_s19 = sld [smem:[#allocation13_spill]] (!%p2832_p7) }
  0x33   : > { %v894_v0 = vld [vmem:[%s3845_s0 + $0x8] sm:$0x1]  ;;  %vm904_vm0 = vcmask 1040384   ;;  %v893_v1 = vld [vmem:[%s3845_s0] sm:$0xff]  ;;  %vm897_vm1 = vcmask 72704   ;;  %vm985_vm2 = vcmask 261120  }
  0x34   : > { %v891_v2 = vld [vmem:[%s828_s20] sm:$0xff]  ;;  %2968 = vmatprep.subr.msk.mxu0 %vm904_vm0, %v894_v0  ;;  %v892_v3 = vld [vmem:[%s828_s20 + $0x8] sm:$0xff] }
  0x35   : > { %2972 = vmatprep.mubr.msk.f32.mxu0 %vm897_vm1, %v891_v2  ;;  %2969 = vmatpush3.msk.msra.mxu0 %vm904_vm0, %v894_v0  ;;  %v895_v5 = vld [vmem:[%s834_s2] sm:$0xff]  ;;  %v896_v6 = vld [vmem:[%s834_s2 + $0x8] sm:$0xff]  ;;  %s3846_s2 = sld [smem:[#allocation12_spill]] }
  0x36   : > { %2970 = vmatprep.subr.mxu0 %v893_v1  ;;  %v2837_v31 = vld [vmem:[%s3847_s19] ss:$0 sm:$0xff] }
  0x37   : > { %2971 = vmatpush3.msra.mxu0 %v893_v1 }
  0x38   : > { %2973 = vmatmul.mubr.msk.f32.vlgmr.msra.gmra.mxu0 %vm897_vm1, %v892_v3 }
  0x3b   : > { %v2836_v29 = vld [vmem:[%s3846_s2] ss:$0 sm:$0xff] }
  0xf8   : > { %v2974_v4 = vpop.f32.mrf.mxu0 }
  0xf9   : > { %v980_v9 = vadd.f32 %v2974_v4, %v896_v6 }
  0xfa   : > { %v974_v7 = vpop.f32.mrf.mxu0 }
  0xfb   : > { %v975_v8 = vadd.f32 %v974_v7, %v895_v5  ;;  %v989_v11 = vsel %vm985_vm2, %v980_v9, 0.0 }
  0xfd   : > { %v986_v10 = vsel %vm985_vm2, %v975_v8, 0.0 }
  0xfe   : > { %987 = vadd.xlane.f32.xlu0 %v986_v10 }
 0x102   : > { %990 = vadd.xlane.f32.xlu0 %v989_v11 }
 0x187   : > { %v988_v12 = vpop.xlane.xlu0 %987 }
 0x188   : > { %v993_v13 = vmul.f32 0.03125, %v988_v12 }
 0x18a   : > { %v995_v14 = vsub.f32 %v975_v8, %v993_v13 }
 0x18b   : > { %v991_v15 = vpop.xlane.xlu0 %990 }
 0x18c   : > { %v994_v16 = vmul.f32 0.03125, %v991_v15  ;;  %v997_v17 = vmul.f32 %v995_v14, %v995_v14 }
 0x18e   : > { %v996_v18 = vsub.f32 %v980_v9, %v994_v16  ;;  %v999_v19 = vsel %vm985_vm2, %v997_v17, 0.0 }
 0x18f   : > { %1000 = vadd.xlane.f32.xlu1 %v999_v19 }
 0x190   : > { %v998_v20 = vmul.f32 %v996_v18, %v996_v18 }
 0x192   : > { %v1002_v21 = vsel %vm985_vm2, %v998_v20, 0.0 }
 0x193   : > { %1003 = vadd.xlane.f32.xlu1 %v1002_v21 }
 0x218   : > { %v1001_v22 = vpop.xlane.xlu1 %1000 }
 0x219   : > { %v1005_v23 = vmul.f32 0.03125, %v1001_v22 }
 0x21b   : > { %v1007_v24 = vadd.f32 1e-05, %v1005_v23 }
 0x21c   : > { %v1004_v25 = vpop.xlane.xlu1 %1003 }
 0x21d   : > { %3157 = vrsqrt.f32 %v1007_v24  ;;  %v1006_v26 = vmul.f32 0.03125, %v1004_v25 }
 0x21f   : > { %v1008_v27 = vadd.f32 1e-05, %v1006_v26 }
 0x221   : > { %3159 = vrsqrt.f32 %v1008_v27 }
 0x22a   : > { %v3158_v28 = vpop.eup %3157 }
 0x22b   : > { %v1011_v30 = vmul.f32 %v3158_v28, %v995_v14 }
 0x22d   : > { %v1019_v32 = vmul.f32 %v2836_v29, %v1011_v30 }
 0x22e   : > { %v3160_v33 = vpop.eup %3159 }
 0x22f   : > { %v1027_v34 = vadd.f32 %v2837_v31, %v1019_v32  ;;  %v1012_v35 = vmul.f32 %v3160_v33, %v996_v18 }
 0x231   : > { %1029 = vst.msk [vmem:[#allocation2] sm:$0xff] %vm985_vm2, %v1027_v34  ;;  %v1020_v36 = vmul.f32 %v2836_v29, %v1012_v35 }
 0x233   : > { %v1028_v37 = vadd.f32 %v2837_v31, %v1020_v36 }
 0x235   : > { %1030 = vst.msk [vmem:[#allocation2 + $0x8] sm:$0xff] %vm985_vm2, %v1028_v37 }
 0x236 PF: > { %vm1044_vm3 = vcmask 261120   ;;  %v3161_v52 = vld [vmem:[%s3444_s30 + $0x8] sm:$0xff]   ;;  %v3265_v53 = vmov 0.0   ;;  %vm3266_vm4 = vmmov 0   ;;  %v3162_v54 = vld [vmem:[%s3444_s30] sm:$0xff]   ;;  %s3848_s15 = sld [smem:[#allocation14_spill]]  ;;  %s3850_s5 = scalar_lea.vmem %s3793_s6, %s3424_s4  ;;  %v1033_v17 = vlaneseq }
 0x237   : > { %2975 = vmatprep.subr.bf16.mxu0 %v3265_v53  ;;  %2979 = vmatprep.mubr.msk.bf16.mxu0 %vm3266_vm4, %v3265_v53  ;;  %v2839_v3 = vld [vmem:[%s3850_s5] ss:$0 sm:$0xff]  ;;  %s3851_s27 = scalar_lea.vmem %s3795_s8, %s3424_s4  ;;  %vm1162_vm5 = vcmask 64512   ;;  %s3267_s9 = smov 96   ;;  %v3268_v22 = vmov -1e+30  }
 0x238   : > { %v3510_v38 = vld [vmem:[#allocation2] sm:$0xff]  ;;  %2976 = vmatpush3.bf16.msra.mxu0 %v3161_v52  ;;  %v1034_v18 = vshrl.u32 %v1033_v17, 7  ;;  %v1037_v20 = vand.u32 127, %v1033_v17  ;;  %vm1250_vm8 = vcmask 130048   ;;  %s3269_s20 = smov 64   ;;  %s3270_s2 = smov 88  }
 0x239   : > { %v1045_v40 = vsel %vm1044_vm3, %v3510_v38, 0.0  ;;  %2977 = vmatprep.subr.bf16.mxu0 %v3265_v53  ;;  %v2840_v8 = vld [vmem:[%s3851_s27] ss:$0 sm:$0xff]  ;;  %s3271_s29 = smov 120   ;;  %vm1572_vm9 = vcmask 1043456   ;;  %s3272_s23 = smov 56  }
 0x23a   : > { %1046 = vadd.xlane.f32.xlu0 %v1045_v40  ;;  %v1035_v19 = vadd.s32 8, %v1034_v18  ;;  %vm1038_vm7 = vcmp.le.s32.totalorder %v1037_v20, %v1034_v18  ;;  %s3273_s19 = smov 80   ;;  %s3274_s17 = smov 112  }
 0x23b   : > { %v3560_v26 = vsel %vm1038_vm7, 0.0, %v3268_v22  ;;  %s3275_s18 = smov 48   ;;  %s3278_s30 = smov 40  }
 0x23c   : > { %v3512_v39 = vld [vmem:[#allocation2 + $0x8] sm:$0xff]  ;;  %2978 = vmatpush3.bf16.msra.mxu0 %v3162_v54  ;;  %s3849_s21 = scalar_lea.vmem %s3848_s15, %s3424_s4  ;;  %vm1039_vm6 = vcmp.le.s32.totalorder %v1037_v20, %v1035_v19  ;;  %s3276_s15 = smov 72  }
 0x23d   : > { %v1048_v41 = vsel %vm1044_vm3, %v3512_v39, 0.0  ;;  %v2838_v63 = vld [vmem:[%s3849_s21] ss:$0 sm:$0xff]  ;;  %v3558_v23 = vsel %vm1039_vm6, 0.0, %v3268_v22  ;;  %s3277_s21 = smov 104   ;;  %s3852_s24 = scalar_lea.vmem %s3797_s10, %s3424_s4 }
 0x23e   : > { %1049 = vadd.xlane.f32.xlu0 %v1048_v41  ;;  %s3853_s27 = sld [smem:[#allocation17_spill]] }
 0x2c3   : > { %v1047_v42 = vpop.xlane.xlu0 %1046 }
 0x2c4   : > { %v1052_v43 = vmul.f32 0.03125, %v1047_v42 }
 0x2c6   : > { %v1054_v44 = vsub.f32 %v3510_v38, %v1052_v43 }
 0x2c7   : > { %v1050_v45 = vpop.xlane.xlu0 %1049 }
 0x2c8   : > { %v1053_v46 = vmul.f32 0.03125, %v1050_v45  ;;  %v1056_v47 = vmul.f32 %v1054_v44, %v1054_v44 }
 0x2ca   : > { %v1055_v48 = vsub.f32 %v3512_v39, %v1053_v46  ;;  %v1058_v49 = vsel %vm1044_vm3, %v1056_v47, 0.0 }
 0x2cb   : > { %1059 = vadd.xlane.f32.xlu1 %v1058_v49 }
 0x2cc   : > { %v1057_v50 = vmul.f32 %v1055_v48, %v1055_v48 }
 0x2ce   : > { %v1061_v51 = vsel %vm1044_vm3, %v1057_v50, 0.0 }
 0x2cf   : > { %1062 = vadd.xlane.f32.xlu1 %v1061_v51 }
 0x354   : > { %v1060_v55 = vpop.xlane.xlu1 %1059 }
 0x355   : > { %v1064_v56 = vmul.f32 0.03125, %v1060_v55 }
 0x357   : > { %v1066_v57 = vadd.f32 1e-05, %v1064_v56 }
 0x358   : > { %v1063_v58 = vpop.xlane.xlu1 %1062 }
 0x359   : > { %3173 = vrsqrt.f32 %v1066_v57  ;;  %v1065_v59 = vmul.f32 0.03125, %v1063_v58 }
 0x35b   : > { %v1067_v60 = vadd.f32 1e-05, %v1065_v59 }
 0x35d   : > { %3175 = vrsqrt.f32 %v1067_v60 }
 0x366   : > { %v3174_v61 = vpop.eup %3173 }
 0x367   : > { %v1070_v62 = vmul.f32 %v3174_v61, %v1054_v44 }
 0x369   : > { %v1078_v2 = vmul.f32 %v2838_v63, %v1070_v62 }
 0x36a   : > { %v3176_v0 = vpop.eup %3175 }
 0x36b   : > { %v1071_v1 = vmul.f32 %v3176_v0, %v1055_v48  ;;  %v1086_v5 = vadd.f32 %v2839_v3, %v1078_v2 }
 0x36d   : > { %v1079_v4 = vmul.f32 %v2838_v63, %v1071_v1 }
 0x36f   : > { %v1087_v6 = vadd.f32 %v2839_v3, %v1079_v4  ;;  %v2856_v4 = vld [vmem:[%s3453_s25 + $0x4] sm:$0xf] }
 0x371   : > { %v1088_v7 = vpack.c.bf16 %v1087_v6, %v1086_v5  ;;  %v1574_v5 = vsel %vm1572_vm9, %v2856_v4, 0 }
 0x373   : > { %2980 = vmatmul.mubr.msk.bf16.vlgmr.msra.gmra.mxu0 %vm1044_vm3, %v1088_v7 }
 0x433   : > { %v1149_v9 = vpop.f32.mrf.mxu0 }
 0x434   : > { %v3544_v10 = vadd.f32 %v2840_v8, %v1149_v9 }
 0x435   : > { %v2981_v11 = vpop.f32.mrf.mxu0 }
 0x436   : > { %1158 = vrot.lane.b32.xlu1 %v3544_v10, %s3267_s9  ;;  %2987 = vmatprep.mubr.msk.f32.mxu0 %vm1162_vm5, %v3544_v10 }
 0x437   : > { %v1152_v12 = vpop.f32.mrf.mxu0 }
 0x438   : > { %v3549_v13 = vadd.f32 %v2840_v8, %v1152_v12 }
 0x439   : > { %v2982_v14 = vpop.f32.mrf.mxu0 }
 0x43a   : > { %1160 = vrot.lane.b32.xlu0 %v3549_v13, %s3267_s9 }
 0x4a8   : > { %v1159_v16 = vpop.permute.xlu1 %1158 }
 0x4ac   : > { %v1161_v15 = vpop.permute.xlu0 %1160 }
 0x4ad   : > { %2983 = vmatprep.subr.msk.mxu0 %vm1162_vm5, %v1161_v15 }
 0x4ae   : > { %2984 = vmatpush3.xpose.msk.msra.mxu0 %vm1162_vm5, %v1161_v15 }
 0x4af   : > { %2985 = vmatprep.subr.msk.mxu0 %vm1162_vm5, %v1159_v16 }
 0x4b2   : > { %2986 = vmatpush3.xpose.msk.msra.mxu0 %vm1162_vm5, %v1159_v16 }
 0x4b5   : > { %2988 = vmatmul.mubr.msk.f32.vlgmr.msra.gmra.mxu0 %vm1162_vm5, %v3549_v13 }
 0x575   : > { %v2989_v21 = vpop.f32.mrf.mxu0 }
 0x576   : > { %v1247_v24 = vmul.f32 0.35355338, %v2989_v21 }
 0x577   : > { %v1237_v25 = vpop.f32.mrf.mxu0 }
 0x578   : > { %v1246_v27 = vmul.f32 0.35355338, %v1237_v25  ;;  %v1249_v28 = vadd.f32 %v1247_v24, %v3558_v23  ;;  %v1361_v25 = vld [vmem:[%s3453_s25] sm:$0xf] }
 0x57a   : > { %v1254_v29 = vsel %vm1250_vm8, %v1249_v28, -inf  ;;  %v1248_v30 = vadd.f32 %v1246_v27, %v3560_v26 }
 0x57b   : > { %1255 = vmax.xlane.f32.xlu0 %v1254_v29 }
 0x57c   : > { %v1251_v31 = vsel %vm1250_vm8, %v1248_v30, -inf }
 0x57d   : > { %1252 = vmax.xlane.f32.xlu1 %v1251_v31 }
 0x604   : > { %v1256_v32 = vpop.xlane.xlu0 %1255 }
 0x605   : > { %v1258_v33 = vsub.f32 %v1249_v28, %v1256_v32 }
 0x606   : > { %v1253_v34 = vpop.xlane.xlu1 %1252 }
 0x607   : > { %v1261_v35 = vmul.f32 1.442695, %v1258_v33  ;;  %v1257_v36 = vsub.f32 %v1248_v30, %v1253_v34  ;;  %v1621_v30 = vsel %vm1572_vm9, %v1361_v25, 0 }
 0x609   : > { %3177 = vpow2.f32 %v1261_v35  ;;  %v1259_v37 = vmul.f32 1.442695, %v1257_v36 }
 0x60b   : > { %3179 = vpow2.f32 %v1259_v37 }
 0x616   : > { %v3178_v40 = vpop.eup %3177 }
 0x617   : > { %v1266_v41 = vsel %vm1250_vm8, %v3178_v40, 0.0 }
 0x618   : > { %v3180_v42 = vpop.eup %3179  ;;  %1267 = vadd.xlane.f32.xlu1 %v1266_v41 }
 0x619   : > { %v1263_v43 = vsel %vm1250_vm8, %v3180_v42, 0.0 }
 0x61a   : > { %1264 = vadd.xlane.f32.xlu0 %v1263_v43 }
 0x629   : > { %1273 = vrot.lane.b32.xlu1 %v3544_v10, %s3269_s20 }
 0x62d   : > { %1368 = vrot.lane.b32.xlu1 %v3549_v13, %s3270_s2 }
 0x630   : > { %1275 = vrot.lane.b32.xlu0 %v3549_v13, %s3269_s20 }
 0x631   : > { %1366 = vrot.lane.b32.xlu1 %v3544_v10, %s3270_s2  ;;  %s3855_s2 = scalar_lea.vmem %s3799_s12, %s3424_s4 }
 0x634   : > { %1362 = vrot.lane.b32.xlu0 %v3544_v10, %s3271_s29 }
 0x635   : > { %1364 = vrot.lane.b32.xlu1 %v3549_v13, %s3271_s29 }
 0x6a1   : > { %v1268_v44 = vpop.xlane.xlu1 %1267 }
 0x6a2   : > { %3181 = vrcp.f32 %v1268_v44 }
 0x6a3   : > { %v1265_v45 = vpop.xlane.xlu0 %1264 }
 0x6a4   : > { %3183 = vrcp.f32 %v1265_v45 }
 0x6a5   : > { %v1274_v46 = vpop.permute.xlu1 %1273 }
 0x6a7   : > { %v1276_v47 = vpop.permute.xlu0 %1275 }
 0x6a8   : > { %2990 = vmatprep.subr.mxu0 %v1276_v47 }
 0x6a9   : > { %2991 = vmatpush3.msra.mxu0 %v1276_v47  ;;  %v1369_v48 = vpop.permute.xlu1 %1368 }
 0x6aa   : > { %2992 = vmatprep.subr.mxu0 %v1274_v46 }
 0x6ab   : > { %2993 = vmatpush3.msra.mxu0 %v1274_v46  ;;  %v1363_v54 = vpop.permute.xlu0 %1362 }
 0x6ac   : > { %2997 = vmatprep.subr.msk.mxu0 %vm1162_vm5, %v1369_v48 }
 0x6ad   : > { %v1367_v55 = vpop.permute.xlu1 %1366 }
 0x6af   : > { %v3182_v49 = vpop.eup %3181 }
 0x6b0   : > { %v1272_v52 = vmul.f32 %v3182_v49, %v3178_v40 }
 0x6b1   : > { %v3184_v50 = vpop.eup %3183  ;;  %v1365_v56 = vpop.permute.xlu1 %1364 }
 0x6b2   : > { %v1271_v51 = vmul.f32 %v3184_v50, %v3180_v42 }
 0x6b4   : > { %2994 = vmatprep.mubr.msk.f32.mxu0 %vm1250_vm8, %v1271_v51 }
 0x6b5   : > { %2995 = vmatmul.mubr.msk.f32.vlgmr.msra.gmra.mxu0 %vm1250_vm8, %v1272_v52 }
 0x6b6   : > { %2998 = vmatpush3.xpose.msk.msra.mxu0 %vm1162_vm5, %v1369_v48  ;;  %3001 = vmatprep.mubr.msk.f32.mxu0 %vm1162_vm5, %v1363_v54 }
 0x6b7   : > { %2999 = vmatprep.subr.msk.mxu0 %vm1162_vm5, %v1367_v55 }
 0x6ba   : > { %3000 = vmatpush3.xpose.msk.msra.mxu0 %vm1162_vm5, %v1367_v55 }
 0x6bb   : > { %3011 = vmatprep.subr.bf16.mxu0 %v3265_v53 }
 0x6bd   : > { %3002 = vmatmul.mubr.msk.f32.vlgmr.msra.gmra.mxu0 %vm1162_vm5, %v1365_v56 }
 0x6be   : > { %3013 = vmatprep.mubr.msk.bf16.mxu0 %vm3266_vm4, %v3265_v53  ;;  %3012 = vmatpush3.bf16.msra.mxu0 %v1574_v5 }
 0x775   : > { %v3585_v57 = vpop.f32.mrf.mxu0 }
 0x777   : > { %v3587_v58 = vpop.f32.mrf.mxu0 }
 0x778   : > { %v1360_v59 = vpack.c.bf16 %v3585_v57, %v3587_v58 }
 0x77d   : > { %v3003_v60 = vpop.f32.mrf.mxu0 }
 0x77e   : > { %v1454_v61 = vmul.f32 0.35355338, %v3003_v60 }
 0x77f   : > { %v1444_v62 = vpop.f32.mrf.mxu0 }
 0x780   : > { %v1453_v63 = vmul.f32 0.35355338, %v1444_v62  ;;  %v1456_v0 = vadd.f32 %v1454_v61, %v3558_v23 }
 0x782   : > { %v1460_v1 = vsel %vm1250_vm8, %v1456_v0, -inf  ;;  %v1455_v2 = vadd.f32 %v1453_v63, %v3560_v26 }
 0x783   : > { %1461 = vmax.xlane.f32.xlu1 %v1460_v1 }
 0x784   : > { %v1457_v3 = vsel %vm1250_vm8, %v1455_v2, -inf }
 0x785   : > { %1458 = vmax.xlane.f32.xlu0 %v1457_v3 }
 0x794   : > { %1479 = vrot.lane.b32.xlu1 %v3544_v10, %s3272_s23 }
 0x798   : > { %1670 = vrot.lane.b32.xlu1 %v3549_v13, %s3273_s19 }
 0x79c   : > { %1668 = vrot.lane.b32.xlu1 %v3544_v10, %s3273_s19  ;;  %s3856_s19 = sld [smem:[#allocation3_spill]] }
 0x7a0   : > { %1666 = vrot.lane.b32.xlu1 %v3549_v13, %s3274_s17 }
 0x7a2   : > { %p2891_p8 = scmp.ne.s32.totalorder %s3856_s19, 1 }
 0x7a3   : > { %s3858_s26 = sld [smem:[#allocation19_spill]] (!%p2891_p8) }
 0x7a4   : > { %s3859_s9 = sld [smem:[#allocation20_spill]] (!%p2891_p8) }
 0x7a5   : > { %s3860_s29 = sld [smem:[#allocation22_spill]] (!%p2891_p8) }
 0x80c   : > { %v1462_v6 = vpop.xlane.xlu1 %1461 }
 0x80d   : > { %v1464_v7 = vsub.f32 %v1456_v0, %v1462_v6 }
 0x80e   : > { %v1459_v8 = vpop.xlane.xlu0 %1458 }
 0x80f   : > { %v1467_v9 = vmul.f32 1.442695, %v1464_v7  ;;  %v1463_v11 = vsub.f32 %v1455_v2, %v1459_v8 }
 0x810   : > { %v1480_v12 = vpop.permute.xlu1 %1479 }
 0x811   : > { %3185 = vpow2.f32 %v1467_v9  ;;  %v1465_v14 = vmul.f32 1.442695, %v1463_v11 }
 0x813   : > { %3187 = vpow2.f32 %v1465_v14 }
 0x814   : > { %v1671_v15 = vpop.permute.xlu1 %1670 }
 0x815   : > { %3023 = vmatprep.subr.msk.mxu0 %vm1162_vm5, %v1671_v15 }
 0x818   : > { %v1669_v36 = vpop.permute.xlu1 %1668 }
 0x81c   : > { %v1667_v42 = vpop.permute.xlu1 %1666 }
 0x81e   : > { %v3186_v16 = vpop.eup %3185 }
 0x81f   : > { %v1472_v17 = vsel %vm1250_vm8, %v3186_v16, 0.0 }
 0x820   : > { %v3188_v18 = vpop.eup %3187  ;;  %1473 = vadd.xlane.f32.xlu0 %v1472_v17 }
 0x821   : > { %v1469_v19 = vsel %vm1250_vm8, %v3188_v18, 0.0 }
 0x824   : > { %1470 = vadd.xlane.f32.xlu0 %v1469_v19 }
 0x83a   : > { %1481 = vrot.lane.b32.xlu0 %v3549_v13, %s3272_s23 }
 0x83e   : > { %1664 = vrot.lane.b32.xlu0 %v3544_v10, %s3274_s17  ;;  %s3857_s17 = sld [smem:[#allocation21_spill]] (!%p2891_p8) }
 0x8a9   : > { %v1474_v20 = vpop.xlane.xlu0 %1473 }
 0x8aa   : > { %3189 = vrcp.f32 %v1474_v20 }
 0x8ad   : > { %v1471_v21 = vpop.xlane.xlu0 %1470 }
 0x8ae   : > { %3191 = vrcp.f32 %v1471_v21 }
 0x8b1   : > { %v1482_v22 = vpop.permute.xlu0 %1481 }
 0x8b2   : > { %3004 = vmatprep.subr.mxu1 %v1482_v22 }
 0x8b3   : > { %3005 = vmatpush3.msra.mxu1 %v1482_v22 }
 0x8b4   : > { %3006 = vmatprep.subr.mxu1 %v1480_v12 }
 0x8b5   : > { %3007 = vmatpush3.msra.mxu1 %v1480_v12  ;;  %v1665_v35 = vpop.permute.xlu0 %1664 }
 0x8b6   : > { %3017 = vmatprep.subr.bf16.mxu1 %v3265_v53 }
 0x8b7   : > { %v3190_v24 = vpop.eup %3189 }
 0x8b8   : > { %v1478_v29 = vmul.f32 %v3190_v24, %v3186_v16  ;;  %v2865_v16 = vld [vmem:[%s3453_s25 + $0x8] sm:$0xf] }
 0x8b9   : > { %v1875_v17 = vsel %vm1572_vm9, %v2865_v16, 0 }
 0x8bb   : > { %v3192_v27 = vpop.eup %3191 }
 0x8bc   : > { %v1477_v28 = vmul.f32 %v3192_v27, %v3188_v18 }
 0x8be   : > { %3008 = vmatprep.mubr.msk.f32.mxu1 %vm1250_vm8, %v1477_v28 }
 0x8bf   : > { %3009 = vmatmul.mubr.msk.f32.vlgmr.msra.gmra.mxu1 %vm1250_vm8, %v1478_v29 }
 0x8c0   : > { %3018 = vmatpush3.bf16.msra.mxu1 %v1621_v30  ;;  %3019 = vmatprep.mubr.msk.bf16.mxu1 %vm3266_vm4, %v3265_v53 }
 0x8c3   : > { %3020 = vmatmul.mubr.msk.bf16.vlgmr.msra.gmra.mxu1 %vm1162_vm5, %v1360_v59 }
 0x97f   : > { %v3010_v31 = vpop.f32.mrf.mxu1 }
 0x981   : > { %v1557_v32 = vpop.f32.mrf.mxu1 }
 0x982   : > { %v1566_v33 = vpack.c.bf16 %v3010_v31, %v1557_v32 }
 0x983   : > { %v3614_v34 = vpop.f32.mrf.mxu1 }
 0x984   : > { %3014 = vmatmul.mubr.msk.bf16.vlgmr.msra.gmra.mxu0 %vm1162_vm5, %v1566_v33 }
 0x985   : > { %3024 = vmatpush3.xpose.msk.msra.mxu0 %vm1162_vm5, %v1671_v15  ;;  %v3021_v37 = vpop.f32.mrf.mxu1  ;;  %3027 = vmatprep.mubr.msk.f32.mxu0 %vm1162_vm5, %v1665_v35 }
 0x986   : > { %3025 = vmatprep.subr.msk.mxu0 %vm1162_vm5, %v1669_v36 }
 0x987   : > { %v3620_v40 = vpop.f32.mrf.mxu1 }
 0x989   : > { %3026 = vmatpush3.xpose.msk.msra.mxu0 %vm1162_vm5, %v1669_v36  ;;  %v3022_v41 = vpop.f32.mrf.mxu1 }
 0x98a   : > { %3037 = vmatprep.subr.bf16.mxu0 %v3265_v53 }
 0x98c   : > { %3028 = vmatmul.mubr.msk.f32.vlgmr.msra.gmra.mxu0 %vm1162_vm5, %v1667_v42 }
 0x98d   : > { %3039 = vmatprep.mubr.msk.bf16.mxu0 %vm3266_vm4, %v3265_v53  ;;  %3038 = vmatpush3.bf16.msra.mxu0 %v1875_v17 }
 0xa44   : > { %v3627_v43 = vpop.f32.mrf.mxu0 }
 0xa46   : > { %v3015_v44 = vpop.f32.mrf.mxu0 }
 0xa47   : > { %v1658_v44 = vadd.f32 %v3614_v34, %v3627_v43 }
 0xa48   : > { %v3629_v45 = vpop.f32.mrf.mxu0 }
 0xa4a   : > { %v3016_v46 = vpop.f32.mrf.mxu0 }
 0xa4c   : > { %v3029_v47 = vpop.f32.mrf.mxu0 }
 0xa4d   : > { %v1756_v48 = vmul.f32 0.35355338, %v3029_v47 }
 0xa4e   : > { %v1746_v49 = vpop.f32.mrf.mxu0 }
 0xa4f   : > { %v1755_v50 = vmul.f32 0.35355338, %v1746_v49  ;;  %v1758_v51 = vadd.f32 %v1756_v48, %v3558_v23  ;;  %v1661_v48 = vadd.f32 %v3620_v40, %v3629_v45  ;;  %v2873_v45 = vld [vmem:[%s3453_s25 + $0xc] sm:$0xf] }
 0xa51   : > { %v1762_v52 = vsel %vm1250_vm8, %v1758_v51, -inf  ;;  %v1757_v54 = vadd.f32 %v1755_v50, %v3560_v26 }
 0xa52   : > { %1763 = vmax.xlane.f32.xlu1 %v1762_v52 }
 0xa53   : > { %v1759_v55 = vsel %vm1250_vm8, %v1757_v54, -inf }
 0xa54   : > { %1760 = vmax.xlane.f32.xlu0 %v1759_v55 }
 0xa63   : > { %1781 = vrot.lane.b32.xlu1 %v3544_v10, %s3275_s18 }
 0xa67   : > { %1926 = vrot.lane.b32.xlu1 %v3549_v13, %s3276_s15 }
 0xa6b   : > { %1924 = vrot.lane.b32.xlu1 %v3544_v10, %s3276_s15 }
 0xa6f   : > { %1922 = vrot.lane.b32.xlu1 %v3549_v13, %s3277_s21 }
 0xadb   : > { %v1764_v56 = vpop.xlane.xlu1 %1763 }
 0xadc   : > { %v1766_v57 = vsub.f32 %v1758_v51, %v1764_v56 }
 0xadd   : > { %v1761_v58 = vpop.xlane.xlu0 %1760 }
 0xade   : > { %v1769_v59 = vmul.f32 1.442695, %v1766_v57  ;;  %v1765_v60 = vsub.f32 %v1757_v54, %v1761_v58  ;;  %v2131_v57 = vsel %vm1572_vm9, %v2873_v45, 0 }
 0xadf   : > { %v1782_v4 = vpop.permute.xlu1 %1781 }
 0xae0   : > { %3193 = vpow2.f32 %v1769_v59  ;;  %v1767_v61 = vmul.f32 1.442695, %v1765_v60 }
 0xae2   : > { %3195 = vpow2.f32 %v1767_v61 }
 0xae3   : > { %v1927_v6 = vpop.permute.xlu1 %1926 }
 0xae7   : > { %v1925_v14 = vpop.permute.xlu1 %1924 }
 0xaeb   : > { %v1923_v15 = vpop.permute.xlu1 %1922 }
 0xaed   : > { %v3194_v62 = vpop.eup %3193 }
 0xaee   : > { %v1774_v63 = vsel %vm1250_vm8, %v3194_v62, 0.0 }
 0xaef   : > { %v3196_v0 = vpop.eup %3195  ;;  %1775 = vadd.xlane.f32.xlu0 %v1774_v63  ;;  %v2875_v63 = vld [vmem:[%s3852_s24] ss:$0 sm:$0xff] }
 0xaf0   : > { %v1771_v1 = vsel %vm1250_vm8, %v3196_v0, 0.0 }
 0xaf3   : > { %1772 = vadd.xlane.f32.xlu0 %v1771_v1 }
 0xb09   : > { %1783 = vrot.lane.b32.xlu0 %v3549_v13, %s3275_s18 }
 0xb0d   : > { %1920 = vrot.lane.b32.xlu0 %v3544_v10, %s3277_s21 }
 0xb78   : > { %v1776_v2 = vpop.xlane.xlu0 %1775 }
 0xb79   : > { %3197 = vrcp.f32 %v1776_v2 }
 0xb7c   : > { %v1773_v3 = vpop.xlane.xlu0 %1772 }
 0xb7d   : > { %3199 = vrcp.f32 %v1773_v3 }
 0xb80   : > { %v1784_v5 = vpop.permute.xlu0 %1783 }
 0xb81   : > { %3030 = vmatprep.subr.mxu1 %v1784_v5 }
 0xb82   : > { %3031 = vmatpush3.msra.mxu1 %v1784_v5 }
 0xb83   : > { %3032 = vmatprep.subr.mxu1 %v1782_v4 }
 0xb84   : > { %3033 = vmatpush3.msra.mxu1 %v1782_v4  ;;  %v1921_v12 = vpop.permute.xlu0 %1920 }
 0xb85   : > { %3043 = vmatprep.subr.msk.mxu1 %vm1162_vm5, %v1927_v6 }
 0xb86   : > { %v3198_v7 = vpop.eup %3197 }
 0xb87   : > { %v1780_v11 = vmul.f32 %v3198_v7, %v3194_v62 }
 0xb8a   : > { %v3200_v8 = vpop.eup %3199 }
 0xb8b   : > { %v1779_v9 = vmul.f32 %v3200_v8, %v3196_v0 }
 0xb8d   : > { %3034 = vmatprep.mubr.msk.f32.mxu1 %vm1250_vm8, %v1779_v9 }
 0xb8e   : > { %3035 = vmatmul.mubr.msk.f32.vlgmr.msra.gmra.mxu1 %vm1250_vm8, %v1780_v11 }
 0xb8f   : > { %3044 = vmatpush3.xpose.msk.msra.mxu1 %vm1162_vm5, %v1927_v6  ;;  %3047 = vmatprep.mubr.msk.f32.mxu1 %vm1162_vm5, %v1921_v12 }
 0xb90   : > { %3045 = vmatprep.subr.msk.mxu1 %vm1162_vm5, %v1925_v14 }
 0xb93   : > { %3046 = vmatpush3.xpose.msk.msra.mxu1 %vm1162_vm5, %v1925_v14 }
 0xb94   : > { %3057 = vmatprep.subr.bf16.mxu1 %v3265_v53 }
 0xb96   : > { %3048 = vmatmul.mubr.msk.f32.vlgmr.msra.gmra.mxu1 %vm1162_vm5, %v1923_v15 }
 0xb97   : > { %3059 = vmatprep.mubr.msk.bf16.mxu1 %vm3266_vm4, %v3265_v53  ;;  %3058 = vmatpush3.bf16.msra.mxu1 %v2131_v57 }
 0xb98   : > { %3071 = vmatprep.subr.bf16.mxu1 %v3265_v53 }
 0xc4e   : > { %v3036_v18 = vpop.f32.mrf.mxu1 }
 0xc50   : > { %v1859_v19 = vpop.f32.mrf.mxu1 }
 0xc51   : > { %v1868_v20 = vpack.c.bf16 %v3036_v18, %v1859_v19 }
 0xc53   : > { %3040 = vmatmul.mubr.msk.bf16.vlgmr.msra.gmra.mxu0 %vm1162_vm5, %v1868_v20  ;;  %v3163_v20 = vld [vmem:[%s3470_s22 + $0x8] sm:$0xff]  }
 0xc56   : > { %v3049_v21 = vpop.f32.mrf.mxu1 }
 0xc57   : > { %v2012_v22 = vmul.f32 0.35355338, %v3049_v21  ;;  %v3164_v21 = vld [vmem:[%s3470_s22] sm:$0xff]   ;;  %s3854_s22 = scalar_lea.vmem %s3853_s27, %s3424_s4 }
 0xc58   : > { %v2002_v24 = vpop.f32.mrf.mxu1 }
 0xc59   : > { %v2011_v25 = vmul.f32 0.35355338, %v2002_v24  ;;  %v2014_v27 = vadd.f32 %v2012_v22, %v3558_v23 }
 0xc5b   : > { %v2018_v28 = vsel %vm1250_vm8, %v2014_v27, -inf  ;;  %v2013_v29 = vadd.f32 %v2011_v25, %v3560_v26 }
 0xc5c   : > { %2019 = vmax.xlane.f32.xlu1 %v2018_v28 }
 0xc5d   : > { %v2015_v30 = vsel %vm1250_vm8, %v2013_v29, -inf }
 0xc5e   : > { %2016 = vmax.xlane.f32.xlu0 %v2015_v30 }
 0xc6d   : > { %2037 = vrot.lane.b32.xlu1 %v3544_v10, %s3278_s30 }
 0xce5   : > { %v2020_v31 = vpop.xlane.xlu1 %2019 }
 0xce6   : > { %v2022_v32 = vsub.f32 %v2014_v27, %v2020_v31 }
 0xce7   : > { %v2017_v33 = vpop.xlane.xlu0 %2016 }
 0xce8   : > { %v2025_v35 = vmul.f32 1.442695, %v2022_v32  ;;  %v2021_v36 = vsub.f32 %v2013_v29, %v2017_v33  ;;  %v2876_v32 = vld [vmem:[%s3854_s22] ss:$0 sm:$0xff] }
 0xce9   : > { %v2038_v56 = vpop.permute.xlu1 %2037 }
 0xcea   : > { %3201 = vpow2.f32 %v2025_v35  ;;  %v2023_v37 = vmul.f32 1.442695, %v2021_v36 }
 0xcec   : > { %3203 = vpow2.f32 %v2023_v37  ;;  %v2877_v37 = vld [vmem:[%s3855_s2] ss:$0 sm:$0xff] }
 0xcf7   : > { %v3202_v23 = vpop.eup %3201 }
 0xcf8   : > { %v2030_v41 = vsel %vm1250_vm8, %v3202_v23, 0.0 }
 0xcf9   : > { %v3204_v42 = vpop.eup %3203  ;;  %2031 = vadd.xlane.f32.xlu0 %v2030_v41 }
 0xcfa   : > { %v2027_v26 = vsel %vm1250_vm8, %v3204_v42, 0.0 }
 0xcfd   : > { %2028 = vadd.xlane.f32.xlu0 %v2027_v26 }
 0xd13   : > { %2039 = vrot.lane.b32.xlu0 %v3549_v13, %s3278_s30  ;;  %v1911_v10 = vpop.f32.mrf.mxu0 }
 0xd14   : > { %v1918_v46 = vadd.f32 %v1911_v10, %v1658_v44  ;;  %v3165_v44 = vld [vmem:[%s3484_s11 + $0x38] sm:$0xff]   ;;  %v3166_v10 = vld [vmem:[%s3484_s11 + $0x30] sm:$0xff]  }
 0xd15   : > { %v3041_v47 = vpop.f32.mrf.mxu0 }
 0xd16   : > { %v3168_v47 = vld [vmem:[%s3484_s11 + $0x20] sm:$0xff]  }
 0xd17   : > { %v1914_v49 = vpop.f32.mrf.mxu0 }
 0xd18   : > { %v1919_v50 = vadd.f32 %v1914_v49, %v1661_v48  ;;  %v3169_v48 = vld [vmem:[%s3484_s11 + $0x18] sm:$0xff]   ;;  %v3170_v49 = vld [vmem:[%s3484_s11 + $0x10] sm:$0xff]  }
 0xd19   : > { %v3042_v51 = vpop.f32.mrf.mxu0 }
 0xd1a   : > { %v3172_v51 = vld [vmem:[%s3484_s11] sm:$0xff]  }
 0xd82   : > { %v2032_v52 = vpop.xlane.xlu0 %2031 }
 0xd83   : > { %3205 = vrcp.f32 %v2032_v52  ;;  %v2878_v52 = vld [vmem:[%s871_s1] ss:$0 sm:$0xff] }
 0xd86   : > { %v2029_v54 = vpop.xlane.xlu0 %2028 }
 0xd87   : > { %3207 = vrcp.f32 %v2029_v54 }
 0xd8a   : > { %v2040_v55 = vpop.permute.xlu0 %2039 }
 0xd8b   : > { %3050 = vmatprep.subr.mxu0 %v2040_v55 }
 0xd8c   : > { %3051 = vmatpush3.msra.mxu0 %v2040_v55 }
 0xd8d   : > { %3052 = vmatprep.subr.mxu0 %v2038_v56 }
 0xd8e   : > { %3053 = vmatpush3.msra.mxu0 %v2038_v56 }
 0xd8f   : > { %3063 = vmatprep.subr.bf16.mxu0 %v3265_v53 }
 0xd90   : > { %v3206_v13 = vpop.eup %3205 }
 0xd91   : > { %v2036_v40 = vmul.f32 %v3206_v13, %v3202_v23 }
 0xd94   : > { %v3208_v34 = vpop.eup %3207 }
 0xd95   : > { %v2035_v43 = vmul.f32 %v3208_v34, %v3204_v42 }
 0xd97   : > { %3054 = vmatprep.mubr.msk.f32.mxu0 %vm1250_vm8, %v2035_v43 }
 0xd98   : > { %3055 = vmatmul.mubr.msk.f32.vlgmr.msra.gmra.mxu0 %vm1250_vm8, %v2036_v40 }
 0xd99   : > { %3067 = vmatprep.mubr.msk.bf16.mxu0 %vm3266_vm4, %v3265_v53  ;;  %3064 = vmatpush3.bf16.msra.mxu0 %v3163_v20 }
 0xd9a   : > { %3065 = vmatprep.subr.bf16.mxu0 %v3265_v53 }
 0xd9d   : > { %3066 = vmatpush3.bf16.msra.mxu0 %v3164_v21 }
 0xe58   : > { %v3056_v58 = vpop.f32.mrf.mxu0 }
 0xe5a   : > { %v2115_v59 = vpop.f32.mrf.mxu0 }
 0xe5b   : > { %v2124_v60 = vpack.c.bf16 %v3056_v58, %v2115_v59 }
 0xe5d   : > { %3060 = vmatmul.mubr.msk.bf16.vlgmr.msra.gmra.mxu1 %vm1162_vm5, %v2124_v60 }
 0xe5e   : > { %3087 = vmatprep.mubr.msk.bf16.mxu1 %vm3266_vm4, %v3265_v53  ;;  %3072 = vmatpush3.bf16.msra.mxu1 %v3165_v44 }
 0xe5f   : > { %3073 = vmatprep.subr.bf16.mxu1 %v3265_v53 }
 0xe62   : > { %3074 = vmatpush3.bf16.msra.mxu1 %v3166_v10 }
 0xe63   : > { %3075 = vmatprep.subr.bf16.mxu1 %v3265_v53 }
 0xf1d   : > { %v2167_v61 = vpop.f32.mrf.mxu1 }
 0xf1e   : > { %v2174_v62 = vadd.f32 %v2167_v61, %v1918_v46  ;;  %v3167_v46 = vld [vmem:[%s3484_s11 + $0x28] sm:$0xff]  }
 0xf1f   : > { %v3061_v0 = vpop.f32.mrf.mxu1  ;;  %3076 = vmatpush3.bf16.msra.mxu1 %v3167_v46 }
 0xf20   : > { %v2176_v1 = vadd.f32 %v2174_v62, %v3510_v38  ;;  %3077 = vmatprep.subr.bf16.mxu1 %v3265_v53 }
 0xf21   : > { %v2170_v2 = vpop.f32.mrf.mxu1 }
 0xf22   : > { %v3686_v3 = vadd.f32 %v2875_v63, %v2176_v1  ;;  %v2175_v4 = vadd.f32 %v2170_v2, %v1919_v50  ;;  %v3171_v50 = vld [vmem:[%s3484_s11 + $0x8] sm:$0xff]  }
 0xf23   : > { %v3062_v5 = vpop.f32.mrf.mxu1  ;;  %3078 = vmatpush3.bf16.msra.mxu1 %v3168_v47 }
 0xf24   : > { %v2177_v6 = vadd.f32 %v2175_v4, %v3512_v39  ;;  %v2189_v7 = vsel %vm1044_vm3, %v3686_v3, 0.0  ;;  %3079 = vmatprep.subr.bf16.mxu1 %v3265_v53 }
 0xf25   : > { %2190 = vadd.xlane.f32.xlu1 %v2189_v7 }
 0xf26   : > { %v3691_v8 = vadd.f32 %v2875_v63, %v2177_v6 }
 0xf27   : > { %3080 = vmatpush3.bf16.msra.mxu1 %v3169_v48 }
 0xf28   : > { %v2192_v9 = vsel %vm1044_vm3, %v3691_v8, 0.0  ;;  %3081 = vmatprep.subr.bf16.mxu1 %v3265_v53 }
 0xf29   : > { %2193 = vadd.xlane.f32.xlu0 %v2192_v9 }
 0xf2b   : > { %3082 = vmatpush3.bf16.msra.mxu1 %v3170_v49  ;;  %v2882_v49 = vld [vmem:[%s879_s3] ss:$0 sm:$0xff] }
 0xf2c   : > { %3083 = vmatprep.subr.bf16.mxu1 %v3265_v53 }
 0xf2f   : > { %3084 = vmatpush3.bf16.msra.mxu1 %v3171_v50 }
 0xf30   : > { %3085 = vmatprep.subr.bf16.mxu1 %v3265_v53 }
 0xf33   : > { %3086 = vmatpush3.bf16.msra.mxu1 %v3172_v51 }
 0xfae   : > { %v2191_v38 = vpop.xlane.xlu1 %2190 }
 0xfaf   : > { %v2195_v11 = vmul.f32 0.03125, %v2191_v38 }
 0xfb1   : > { %v2197_v12 = vsub.f32 %v3686_v3, %v2195_v11 }
 0xfb2   : > { %v2194_v14 = vpop.xlane.xlu0 %2193 }
 0xfb3   : > { %v2196_v15 = vmul.f32 0.03125, %v2194_v14  ;;  %v2199_v16 = vmul.f32 %v2197_v12, %v2197_v12 }
 0xfb5   : > { %v2198_v39 = vsub.f32 %v3691_v8, %v2196_v15  ;;  %v2201_v17 = vsel %vm1044_vm3, %v2199_v16, 0.0 }
 0xfb6   : > { %2202 = vadd.xlane.f32.xlu0 %v2201_v17 }
 0xfb7   : > { %v2200_v18 = vmul.f32 %v2198_v39, %v2198_v39 }
 0xfb9   : > { %v2204_v19 = vsel %vm1044_vm3, %v2200_v18, 0.0 }
 0xfba   : > { %2205 = vadd.xlane.f32.xlu1 %v2204_v19 }
0x103f   : > { %v2203_v22 = vpop.xlane.xlu0 %2202 }
0x1040   : > { %v2207_v24 = vmul.f32 0.03125, %v2203_v22 }
0x1042   : > { %v2209_v25 = vadd.f32 1e-05, %v2207_v24 }
0x1043   : > { %v2206_v27 = vpop.xlane.xlu1 %2205 }
0x1044   : > { %3209 = vrsqrt.f32 %v2209_v25  ;;  %v2208_v28 = vmul.f32 0.03125, %v2206_v27 }
0x1046   : > { %v2210_v29 = vadd.f32 1e-05, %v2208_v28 }
0x1048   : > { %3211 = vrsqrt.f32 %v2210_v29 }
0x1051   : > { %v3210_v30 = vpop.eup %3209 }
0x1052   : > { %v2213_v31 = vmul.f32 %v3210_v30, %v2197_v12 }
0x1054   : > { %v2221_v36 = vmul.f32 %v2876_v32, %v2213_v31 }
0x1055   : > { %v3212_v33 = vpop.eup %3211 }
0x1056   : > { %v2214_v35 = vmul.f32 %v3212_v33, %v2198_v39  ;;  %v2229_v41 = vadd.f32 %v2877_v37, %v2221_v36 }
0x1058   : > { %v2222_v23 = vmul.f32 %v2876_v32, %v2214_v35  ;;  %v3279_v32 = vmov -1.0  }
0x105a   : > { %v2230_v42 = vadd.f32 %v2877_v37, %v2222_v23 }
0x105c   : > { %v2231_v26 = vpack.c.bf16 %v2230_v42, %v2229_v41 }
0x105e   : > { %3068 = vmatmul.mubr.msk.bf16.vlgmr.msra.gmra.mxu0 %vm1044_vm3, %v2231_v26 }
0x111e   : > { %v2292_v54 = vpop.f32.mrf.mxu0 }
0x111f   : > { %v2293_v55 = vadd.f32 %v2878_v52, %v2292_v54 }
0x1120   : > { %v3069_v56 = vpop.f32.mrf.mxu0 }
0x1121   : > { %v2301_v13 = vmul.f32 0.70710677, %v2293_v55  ;;  %v2299_v26 = vmul.f32 0.5, %v2293_v55 }
0x1122   : > { %v2295_v34 = vpop.f32.mrf.mxu0 }
0x1123   : > { %v2307_v43 = vand.u32 2147483647, %v2301_v13  ;;  %v2296_v40 = vadd.f32 %v2878_v52, %v2295_v34  ;;  %vm2303_vm10 = vcmp.ge.f32.partialorder %v2301_v13, 0.0 }
0x1124   : > { %v3070_v45 = vpop.f32.mrf.mxu0  ;;  %v2305_v33 = vsel %vm2303_vm10, 1.0, %v3279_v32 }
0x1125   : > { %v2309_v57 = vmul.f32 0.3275911, %v2307_v43  ;;  %v2302_v58 = vmul.f32 0.70710677, %v2296_v40  ;;  %v2335_v62 = vsub.f32 0.0, %v2307_v43  ;;  %v2300_v44 = vmul.f32 0.5, %v2296_v40 }
0x1127   : > { %v2311_v59 = vadd.f32 1.0, %v2309_v57  ;;  %v2308_v60 = vand.u32 2147483647, %v2302_v58  ;;  %v2337_v63 = vmul.f32 %v2335_v62, %v2307_v43  ;;  %vm2304_vm11 = vcmp.ge.f32.partialorder %v2302_v58, 0.0 }
0x1128   : > { %v2306_v23 = vsel %vm2304_vm11, 1.0, %v3279_v32 }
0x1129   : > { %3213 = vrcp.f32 %v2311_v59  ;;  %v2310_v53 = vmul.f32 0.3275911, %v2308_v60  ;;  %v2336_v0 = vsub.f32 0.0, %v2308_v60  ;;  %v2339_v4 = vmul.f32 1.442695, %v2337_v63 }
0x112b   : > { %v2312_v61 = vadd.f32 1.0, %v2310_v53  ;;  %v2338_v5 = vmul.f32 %v2336_v0, %v2308_v60 }
0x112d   : > { %3215 = vrcp.f32 %v2312_v61  ;;  %v2341_v11 = vmul.f32 1.442695, %v2338_v5 }
0x112e   : > { %3217 = vpow2.f32 %v2339_v4 }
0x112f   : > { %3219 = vpow2.f32 %v2341_v11 }
0x1136   : > { %v3214_v1 = vpop.eup %3213 }
0x1137   : > { %v2317_v2 = vmul.f32 1.0614054, %v3214_v1 }
0x1139   : > { %v2319_v6 = vadd.f32 -1.4531521, %v2317_v2 }
0x113a   : > { %v3216_v7 = vpop.eup %3215 }
0x113b   : > { %v2321_v9 = vmul.f32 %v3214_v1, %v2319_v6  ;;  %v2318_v38 = vmul.f32 1.0614054, %v3216_v7  ;;  %v3218_v25 = vpop.eup %3217 }
0x113c   : > { %v3220_v31 = vpop.eup %3219 }
0x113d   : > { %v2323_v12 = vadd.f32 1.4214138, %v2321_v9  ;;  %v2320_v14 = vadd.f32 -1.4531521, %v2318_v38 }
0x113f   : > { %v2325_v15 = vmul.f32 %v3214_v1, %v2323_v12  ;;  %v2322_v16 = vmul.f32 %v3216_v7, %v2320_v14 }
0x1141   : > { %v2327_v39 = vadd.f32 -0.28449672, %v2325_v15  ;;  %v2324_v17 = vadd.f32 1.4214138, %v2322_v16 }
0x1143   : > { %v2329_v18 = vmul.f32 %v3214_v1, %v2327_v39  ;;  %v2326_v19 = vmul.f32 %v3216_v7, %v2324_v17 }
0x1145   : > { %v2331_v20 = vadd.f32 0.2548296, %v2329_v18  ;;  %v2328_v21 = vadd.f32 -0.28449672, %v2326_v19 }
0x1147   : > { %v2333_v22 = vmul.f32 %v3214_v1, %v2331_v20  ;;  %v2330_v24 = vmul.f32 %v3216_v7, %v2328_v21 }
0x1149   : > { %v2343_v27 = vmul.f32 %v3218_v25, %v2333_v22  ;;  %v2332_v28 = vadd.f32 0.2548296, %v2330_v24 }
0x114b   : > { %v2345_v29 = vsub.f32 1.0, %v2343_v27  ;;  %v2334_v30 = vmul.f32 %v3216_v7, %v2332_v28 }
0x114d   : > { %v2347_v35 = vmul.f32 %v2345_v29, %v2305_v33  ;;  %v2344_v36 = vmul.f32 %v3220_v31, %v2334_v30 }
0x114f   : > { %v2346_v37 = vsub.f32 1.0, %v2344_v36  ;;  %v2349_v41 = vadd.f32 1.0, %v2347_v35 }
0x1151   : > { %v2348_v42 = vmul.f32 %v2346_v37, %v2306_v23  ;;  %v2351_v46 = vmul.f32 %v2349_v41, %v2299_v26 }
0x1153   : > { %v2350_v10 = vadd.f32 1.0, %v2348_v42 }
0x1155   : > { %v2352_v47 = vmul.f32 %v2350_v10, %v2300_v44 }
0x1157   : > { %v2353_v48 = vpack.c.bf16 %v2352_v47, %v2351_v46 }
0x1159   : > { %3088 = vmatmul.mubr.bf16.vlgmr.msra.gmra.mxu1 %v2353_v48 }
0x1219   : > { %v2459_v50 = vpop.f32.mrf.mxu1 }
0x121a   : > { %v2460_v51 = vadd.f32 %v2882_v49, %v2459_v50 }
0x121b   : > { %v3089_v52 = vpop.f32.mrf.mxu1 }
0x121c   : > { %v2466_v54 = vadd.f32 %v2460_v51, %v3686_v3 }
0x121d   : > { %v2462_v56 = vpop.f32.mrf.mxu1 }
0x121e   : > { %2468 = vst.msk [vmem:[#allocation2] sm:$0xff] %vm1044_vm3, %v2466_v54  ;;  %v2463_v55 = vadd.f32 %v2882_v49, %v2462_v56  ;;  %2473 = sbr.rel (%p2891_p8) target bundleno = 5153 (0x1421), region = 112 }
0x121f   : > { %v3090_v13 = vpop.f32.mrf.mxu1 }
0x1220   : > { %v2467_v34 = vadd.f32 %v2463_v55, %v3691_v8 }
0x1222   : > { %2469 = vst.msk [vmem:[#allocation2 + $0x8] sm:$0xff] %vm1044_vm3, %v2467_v34 }
0x1223   : > { %v2476_v43 = vsel %vm1044_vm3, %v2466_v54, 0.0  ;;  %v2479_v40 = vsel %vm1044_vm3, %v2467_v34, 0.0  ;;  %v2521_v63 = vld [vmem:[%s3857_s17 + $0x18] sm:$0xff]  ;;  %v2520_v0 = vld [vmem:[%s3857_s17 + $0x10] sm:$0xff]  ;;  %v2519_v1 = vld [vmem:[%s3857_s17 + $0x8] sm:$0xff]  ;;  %vm2610_vm12 = vcmask 72704  }
0x1224   : > { %2477 = vadd.xlane.f32.xlu0 %v2476_v43  ;;  %3091 = vmatprep.subr.mxu0 %v2521_v63  ;;  %v2518_v2 = vld [vmem:[%s3857_s17] sm:$0xff] }
0x1225   : > { %3092 = vmatpush3.msra.mxu0 %v2521_v63  ;;  %v2892_v12 = vld [vmem:[%s3858_s26] ss:$0 sm:$0xff] }
0x1226   : > { %3093 = vmatprep.subr.mxu0 %v2520_v0  ;;  %v2893_v15 = vld [vmem:[%s3859_s9] ss:$0 sm:$0xff] }
0x1227   : > { %3094 = vmatpush3.msra.mxu0 %v2520_v0  ;;  %v2894_v22 = vld [vmem:[%s3860_s29] ss:$0 sm:$0xff] }
0x1228   : > { %2480 = vadd.xlane.f32.xlu0 %v2479_v40  ;;  %3095 = vmatprep.subr.mxu0 %v2519_v1 }
0x1229   : > { %3096 = vmatpush3.msra.mxu0 %v2519_v1 }
0x122a   : > { %3097 = vmatprep.subr.mxu0 %v2518_v2 }
0x122b   : > { %3098 = vmatpush3.msra.mxu0 %v2518_v2 }
0x12ad   : > { %v2478_v45 = vpop.xlane.xlu0 %2477 }
0x12ae   : > { %v2482_v3 = vmul.f32 0.03125, %v2478_v45 }
0x12b0   : > { %v2484_v57 = vsub.f32 %v2466_v54, %v2482_v3 }
0x12b1   : > { %v2481_v58 = vpop.xlane.xlu0 %2480 }
0x12b2   : > { %v2483_v59 = vmul.f32 0.03125, %v2481_v58  ;;  %v2486_v60 = vmul.f32 %v2484_v57, %v2484_v57 }
0x12b4   : > { %v2485_v53 = vsub.f32 %v2467_v34, %v2483_v59  ;;  %v2488_v8 = vsel %vm1044_vm3, %v2486_v60, 0.0 }
0x12b5   : > { %2489 = vadd.xlane.f32.xlu1 %v2488_v8 }
0x12b6   : > { %v2487_v61 = vmul.f32 %v2485_v53, %v2485_v53 }
0x12b8   : > { %v2491_v62 = vsel %vm1044_vm3, %v2487_v61, 0.0 }
0x12b9   : > { %2492 = vadd.xlane.f32.xlu1 %v2491_v62 }
0x133e   : > { %v2490_v4 = vpop.xlane.xlu1 %2489 }
0x133f   : > { %v2494_v5 = vmul.f32 0.03125, %v2490_v4 }
0x1341   : > { %v2496_v6 = vadd.f32 1e-05, %v2494_v5 }
0x1342   : > { %v2493_v7 = vpop.xlane.xlu1 %2492 }
0x1343   : > { %3221 = vrsqrt.f32 %v2496_v6  ;;  %v2495_v9 = vmul.f32 0.03125, %v2493_v7 }
0x1345   : > { %v2497_v38 = vadd.f32 1e-05, %v2495_v9 }
0x1347   : > { %3223 = vrsqrt.f32 %v2497_v38 }
0x1350   : > { %v3222_v11 = vpop.eup %3221 }
0x1351   : > { %v2500_v14 = vmul.f32 %v3222_v11, %v2484_v57 }
0x1353   : > { %v2508_v16 = vmul.f32 %v2892_v12, %v2500_v14 }
0x1354   : > { %v3224_v39 = vpop.eup %3223 }
0x1355   : > { %v2501_v17 = vmul.f32 %v3224_v39, %v2485_v53  ;;  %v2516_v18 = vadd.f32 %v2893_v15, %v2508_v16 }
0x1357   : > { %v2509_v19 = vmul.f32 %v2892_v12, %v2501_v17  ;;  %3099 = vmatprep.mubr.msk.f32.mxu0 %vm1044_vm3, %v2516_v18 }
0x1359   : > { %v2517_v20 = vadd.f32 %v2893_v15, %v2509_v19 }
0x135b   : > { %3100 = vmatmul.mubr.msk.f32.vlgmr.msra.gmra.mxu0 %vm1044_vm3, %v2517_v20 }
0x141b   : > { %v3101_v21 = vpop.f32.mrf.mxu0 }
0x141c   : > { %v2607_v27 = vadd.f32 %v3101_v21, %v2894_v22 }
0x141d   : > { %v2601_v24 = vpop.f32.mrf.mxu0 }
0x141e   : > { %v2602_v25 = vadd.f32 %v2894_v22, %v2601_v24  ;;  %2612 = vst.msk [vmem:[%s3489_s7 + $0x8] sm:$0xff] %vm2610_vm12, %v2607_v27 }
0x1420   : > { %2611 = vst.msk [vmem:[%s3489_s7] sm:$0xff] %vm2610_vm12, %v2602_v25 }
0x1421 PF: > { %s3861_s23 = sld [smem:[#allocation6_spill]] }
0x1422   : > { %s3862_s2 = sld [smem:[#allocation4_spill]] }
0x1423   : > { %s3863_s25 = sld [smem:[#allocation5_spill]] }
0x1424   : > { %s3864_s26 = sld [smem:[#allocation7_spill]] }
0x1425   : > { %s3865_s27 = sld [smem:[#allocation8_spill]] }
0x1427   : > { %s31_s3 = sadd.s32 1, %s3861_s23  }
0x1428   : > { %p28_p9 = scmp.ge.s32.totalorder %s31_s3, 6  }
0x142a   :  { %30 = sbr.rel (!%p28_p9) target bundleno = 16 (0x10), region = 184 }

</bundles_post_ra>
